<compile_context>
chip_gen: v7x
topology: tpu7x:2x2x1
jax: 0.10.0
libtpu: 0.0.40
codegen_flags: <defaults>
</compile_context>

<pallas_src>
import jax
import jax.numpy as jnp
from jax.experimental import pallas as pl
from jax.experimental.pallas import tpu as pltpu


def _round_up(x, m):
    return (x + m - 1) // m * m


def residual_lstm_kernel(x_ref, wih_ref, whh_ref, b_ref, wl_ref, bl_ref,
                         out_ref, h_scr, c_scr, gx_buf, h_buf):
    T, Bp, Dp = x_ref.shape

    # Zero-init hidden/cell state at the first chunk (PyTorch default h0=c0=0).
    @pl.when(pl.program_id(0) == 0)
    def _():
        h_scr[...] = jnp.zeros_like(h_scr)
        c_scr[...] = jnp.zeros_like(c_scr)

    # ---- Chunk-level input projection: one (T*Bp, Dp) @ (Dp, 4Dp) matmul ----
    # Bias (b_ih + b_hh) is folded in here, so it never appears in the loop.
    x2 = x_ref[...].reshape(T * Bp, Dp)
    gx = jnp.dot(x2, wih_ref[...], preferred_element_type=jnp.float32) + b_ref[...]
    gx_buf[...] = gx.reshape(T, Bp, 4 * Dp)

    whh = whh_ref[...]  # (Dp, 4Dp), resident

    # ---- Serial recurrence: only h_prev @ W_hh on the critical path --------
    def step(t, carry):
        h, c = carry
        g = gx_buf[t] + jnp.dot(h, whh, preferred_element_type=jnp.float32)
        i_g = jax.nn.sigmoid(g[:, 0 * Dp:1 * Dp])
        f_g = jax.nn.sigmoid(g[:, 1 * Dp:2 * Dp])
        g_g = jnp.tanh(g[:, 2 * Dp:3 * Dp])
        o_g = jax.nn.sigmoid(g[:, 3 * Dp:4 * Dp])
        c = f_g * c + i_g * g_g
        h = o_g * jnp.tanh(c)
        h_buf[t] = h
        return h, c

    h_fin, c_fin = jax.lax.fori_loop(
        0, T, step, (h_scr[...], c_scr[...]), unroll=True)

    # Spill carry to scratch only at the chunk boundary.
    h_scr[...] = h_fin
    c_scr[...] = c_fin

    # ---- Chunk-level output Linear + residual + ReLU (lane-dense store) ----
    h_all = h_buf[...].reshape(T * Bp, Dp)
    y = jnp.dot(h_all, wl_ref[...], preferred_element_type=jnp.float32) + bl_ref[...]
    res = x_ref[...].reshape(T * Bp, Dp)
    out = jnp.maximum(res + y, 0.0)
    out_ref[...] = out.reshape(T, Bp, Dp).astype(out_ref.dtype)


def residual_lstm(x, W_ih, W_hh, b_ih, b_hh, W_lin, b_lin, *, t_chunk=None):
    """x: (S, B, D) float32.  Weights in PyTorch convention:
       W_ih, W_hh: (4D, D) with gate order [i, f, g, o]; b_*: (4D,);
       W_lin: (D, D); b_lin: (D,)."""
    S, B, D = x.shape
    Bp = _round_up(B, 8)      # sublane alignment
    Dp = _round_up(D, 128)    # lane alignment
    if t_chunk is None:
        t_chunk = min(S, 32)
    Sp = _round_up(S, t_chunk)

    # Zero-pad x.  Padded lanes/rows stay exactly zero through the LSTM
    # (sigmoid(0)*0 accumulation), so slicing back at the end is exact.
    x_p = jnp.zeros((Sp, Bp, Dp), x.dtype).at[:S, :B, :D].set(x)

    def pack_gates(W):
        # (4D, D) PyTorch -> (Dp, 4*Dp): gate k occupies columns [k*Dp, k*Dp+D)
        blocks = []
        for k in range(4):
            Wk = W[k * D:(k + 1) * D, :].T                    # (D, D)
            Wk = jnp.pad(Wk, ((0, Dp - D), (0, Dp - D)))      # (Dp, Dp)
            blocks.append(Wk)
        return jnp.concatenate(blocks, axis=1)                # (Dp, 4Dp)

    wih = pack_gates(W_ih)
    whh = pack_gates(W_hh)

    b_sum = b_ih + b_hh
    b_blocks = [jnp.pad(b_sum[k * D:(k + 1) * D], (0, Dp - D)) for k in range(4)]
    bfull = jnp.concatenate(b_blocks).reshape(1, 4 * Dp)      # (1, 4Dp)

    wl = jnp.pad(W_lin.T, ((0, Dp - D), (0, Dp - D)))         # (Dp, Dp)
    bl = jnp.pad(b_lin, (0, Dp - D)).reshape(1, Dp)           # (1, Dp)

    grid_spec = pltpu.PrefetchScalarGridSpec(
        num_scalar_prefetch=0,
        grid=(Sp // t_chunk,),
        in_specs=[
            pl.BlockSpec((t_chunk, Bp, Dp), lambda n: (n, 0, 0)),  # x chunk
            pl.BlockSpec((Dp, 4 * Dp), lambda n: (0, 0)),          # W_ih^T fused
            pl.BlockSpec((Dp, 4 * Dp), lambda n: (0, 0)),          # W_hh^T fused
            pl.BlockSpec((1, 4 * Dp), lambda n: (0, 0)),           # b_ih + b_hh
            pl.BlockSpec((Dp, Dp), lambda n: (0, 0)),              # W_lin^T
            pl.BlockSpec((1, Dp), lambda n: (0, 0)),               # b_lin
        ],
        out_specs=pl.BlockSpec((t_chunk, Bp, Dp), lambda n: (n, 0, 0)),
        scratch_shapes=[
            pltpu.VMEM((Bp, Dp), jnp.float32),                 # h carry
            pltpu.VMEM((Bp, Dp), jnp.float32),                 # c carry
            pltpu.VMEM((t_chunk, Bp, 4 * Dp), jnp.float32),    # x-gate preacts
            pltpu.VMEM((t_chunk, Bp, Dp), jnp.float32),        # hidden states
        ],
    )

    out = pl.pallas_call(
        residual_lstm_kernel,
        out_shape=jax.ShapeDtypeStruct((Sp, Bp, Dp), x.dtype),
        grid_spec=grid_spec,
        compiler_params=pltpu.CompilerParams(
            dimension_semantics=("arbitrary",)),  # sequential recurrence
    )(x_p, wih, whh, bfull, wl, bl)

    return out[:S, :B, :D]


def residual_lstm_ref(x, W_ih, W_hh, b_ih, b_hh, W_lin, b_lin):
    """Pure-JAX reference mirroring PyTorch semantics."""
    S, B, D = x.shape
    h = jnp.zeros((B, D), jnp.float32)
    c = jnp.zeros((B, D), jnp.float32)
    outs = []
    for t in range(S):
        gates = x[t] @ W_ih.T + b_ih + h @ W_hh.T + b_hh
        i = jax.nn.sigmoid(gates[:, 0 * D:1 * D])
        f = jax.nn.sigmoid(gates[:, 1 * D:2 * D])
        g = jnp.tanh(gates[:, 2 * D:3 * D])
        o = jax.nn.sigmoid(gates[:, 3 * D:4 * D])
        c = f * c + i * g
        h = o * jnp.tanh(c)
        y = h @ W_lin.T + b_lin
        outs.append(jnp.maximum(x[t] + y, 0.0))
    return jnp.stack(outs)


if __name__ == "__main__":
    S, B, D = 8, 4, 32  # seq=8, batch=4, d_model=32

    key = jax.random.PRNGKey(0)
    kx, k1, k2, k3, k4, k5, k6 = jax.random.split(key, 7)

    scale = 1.0 / jnp.sqrt(D)
    x = jax.random.normal(kx, (S, B, D), dtype=jnp.float32)
    W_ih = jax.random.uniform(k1, (4 * D, D), jnp.float32, -scale, scale)
    W_hh = jax.random.uniform(k2, (4 * D, D), jnp.float32, -scale, scale)
    b_ih = jax.random.uniform(k3, (4 * D,), jnp.float32, -scale, scale)
    b_hh = jax.random.uniform(k4, (4 * D,), jnp.float32, -scale, scale)
    W_lin = jax.random.uniform(k5, (D, D), jnp.float32, -scale, scale)
    b_lin = jax.random.uniform(k6, (D,), jnp.float32, -scale, scale)

    out = residual_lstm(x, W_ih, W_hh, b_ih, b_hh, W_lin, b_lin)
    out = jax.block_until_ready(out)

    ref = residual_lstm_ref(x, W_ih, W_hh, b_ih, b_hh, W_lin, b_lin)
    assert out.shape == (S, B, D)
    assert jnp.allclose(out, ref, atol=1e-4, rtol=1e-4), "mismatch vs reference"

    print("KERNEL_OK")
</pallas_src>

<mosaic_0001>
module attributes {stable_mosaic.version = 11 : i64} {
  func.func @residual_lstm_kernel(%arg0: i32, %arg1: memref<8x8x128xf32, #tpu.memory_space<vmem>>, %arg2: memref<128x512xf32, #tpu.memory_space<vmem>>, %arg3: memref<128x512xf32, #tpu.memory_space<vmem>>, %arg4: memref<1x512xf32, #tpu.memory_space<vmem>>, %arg5: memref<128x128xf32, #tpu.memory_space<vmem>>, %arg6: memref<1x128xf32, #tpu.memory_space<vmem>>, %arg7: memref<8x8x128xf32, #tpu.memory_space<vmem>>, %arg8: memref<8x128xf32, #tpu.memory_space<vmem>>, %arg9: memref<8x128xf32, #tpu.memory_space<vmem>>, %arg10: memref<8x8x512xf32, #tpu.memory_space<vmem>>, %arg11: memref<8x8x128xf32, #tpu.memory_space<vmem>>) attributes {dimension_semantics = [#tpu.dimension_semantics<arbitrary>], iteration_bounds = array<i64: 1>, scalar_prefetch = 0 : i64, scratch_operands = 4 : i64, tpu.core_type = #tpu.core_type<tc>, window_params = [{transform_indices = @transform_0, window_bounds = array<i64: 8, 8, 128>}, {pipeline_mode = #tpu.pipeline_mode<synchronous>, transform_indices = @transform_1, window_bounds = array<i64: 128, 512>}, {pipeline_mode = #tpu.pipeline_mode<synchronous>, transform_indices = @transform_2, window_bounds = array<i64: 128, 512>}, {pipeline_mode = #tpu.pipeline_mode<synchronous>, transform_indices = @transform_3, window_bounds = array<i64: 1, 512>}, {pipeline_mode = #tpu.pipeline_mode<synchronous>, transform_indices = @transform_4, window_bounds = array<i64: 128, 128>}, {pipeline_mode = #tpu.pipeline_mode<synchronous>, transform_indices = @transform_5, window_bounds = array<i64: 1, 128>}, {transform_indices = @transform_6, window_bounds = array<i64: 8, 8, 128>}]} {
    %c0_i32 = arith.constant 0 : i32
    %0 = arith.cmpi eq, %arg0, %c0_i32 : i32
    %1 = arith.extui %0 : i1 to i32
    %c0_i32_0 = arith.constant 0 : i32
    %2 = arith.cmpi ne, %1, %c0_i32_0 : i32
    scf.if %2 {
      %cst_100 = arith.constant 0.000000e+00 : f32
      %303 = vector.broadcast %cst_100 : f32 to vector<8x128xf32>
      %c0_101 = arith.constant 0 : index
      %c0_102 = arith.constant 0 : index
      %304 = vector.load %arg8[%c0_101, %c0_102] : memref<8x128xf32, #tpu.memory_space<vmem>>, vector<8x128xf32>
      tpu.vector_store %arg8[%c0_101, %c0_102], %303 {strides = array<i32>} : memref<8x128xf32, #tpu.memory_space<vmem>>, vector<8x128xf32>,
      %cst_103 = arith.constant 0.000000e+00 : f32
      %305 = vector.broadcast %cst_103 : f32 to vector<8x128xf32>
      %c0_104 = arith.constant 0 : index
      %c0_105 = arith.constant 0 : index
      %306 = vector.load %arg9[%c0_104, %c0_105] : memref<8x128xf32, #tpu.memory_space<vmem>>, vector<8x128xf32>
      tpu.vector_store %arg9[%c0_104, %c0_105], %305 {strides = array<i32>} : memref<8x128xf32, #tpu.memory_space<vmem>>, vector<8x128xf32>,
    } else {
    }
    %c0 = arith.constant 0 : index
    %c0_1 = arith.constant 0 : index
    %c0_2 = arith.constant 0 : index
    %3 = vector.load %arg1[%c0, %c0_1, %c0_2] : memref<8x8x128xf32, #tpu.memory_space<vmem>>, vector<8x8x128xf32>
    %4 = vector.shape_cast %3 : vector<8x8x128xf32> to vector<64x128xf32>
    %c0_3 = arith.constant 0 : index
    %c0_4 = arith.constant 0 : index
    %5 = vector.load %arg2[%c0_3, %c0_4] : memref<128x512xf32, #tpu.memory_space<vmem>>, vector<128x512xf32>
    %cst = arith.constant dense<0.000000e+00> : vector<64x512xf32>
    %6 = tpu.matmul %4, %5, %cst {dimension_numbers = #tpu.dot_dimension_numbers<[1], [0], [0], [1], [0, 0, 1, 1], [], []>} : vector<64x128xf32>, vector<128x512xf32>, vector<64x512xf32> -> vector<64x512xf32>
    %c0_5 = arith.constant 0 : index
    %c0_6 = arith.constant 0 : index
    %7 = vector.load %arg4[%c0_5, %c0_6] : memref<1x512xf32, #tpu.memory_space<vmem>>, vector<1x512xf32>
    %8 = vector.broadcast %7 : vector<1x512xf32> to vector<64x512xf32>
    %9 = arith.addf %6, %8 : vector<64x512xf32>
    %10 = vector.shape_cast %9 : vector<64x512xf32> to vector<8x8x512xf32>
    %c0_7 = arith.constant 0 : index
    %c0_8 = arith.constant 0 : index
    %c0_9 = arith.constant 0 : index
    %11 = vector.load %arg10[%c0_7, %c0_8, %c0_9] : memref<8x8x512xf32, #tpu.memory_space<vmem>>, vector<8x8x512xf32>
    tpu.vector_store %arg10[%c0_7, %c0_8, %c0_9], %10 {strides = array<i32>} : memref<8x8x512xf32, #tpu.memory_space<vmem>>, vector<8x8x512xf32>,
    %c0_10 = arith.constant 0 : index
    %c0_11 = arith.constant 0 : index
    %12 = vector.load %arg3[%c0_10, %c0_11] : memref<128x512xf32, #tpu.memory_space<vmem>>, vector<128x512xf32>
    %c0_12 = arith.constant 0 : index
    %c0_13 = arith.constant 0 : index
    %13 = vector.load %arg8[%c0_12, %c0_13] : memref<8x128xf32, #tpu.memory_space<vmem>>, vector<8x128xf32>
    %c0_14 = arith.constant 0 : index
    %c0_15 = arith.constant 0 : index
    %14 = vector.load %arg9[%c0_14, %c0_15] : memref<8x128xf32, #tpu.memory_space<vmem>>, vector<8x128xf32>
    %c0_i32_16 = arith.constant 0 : i32
    %15 = arith.index_cast %c0_i32_16 : i32 to index
    %c0_17 = arith.constant 0 : index
    %c0_18 = arith.constant 0 : index
    %16 = vector.load %arg10[%15, %c0_17, %c0_18] : memref<8x8x512xf32, #tpu.memory_space<vmem>>, vector<1x8x512xf32>
    %17 = vector.shape_cast %16 : vector<1x8x512xf32> to vector<8x512xf32>
    %cst_19 = arith.constant dense<0.000000e+00> : vector<8x512xf32>
    %18 = tpu.matmul %13, %12, %cst_19 {dimension_numbers = #tpu.dot_dimension_numbers<[1], [0], [0], [1], [0, 0, 1, 1], [], []>} : vector<8x128xf32>, vector<128x512xf32>, vector<8x512xf32> -> vector<8x512xf32>
    %19 = arith.addf %17, %18 : vector<8x512xf32>
    %20 = vector.extract_strided_slice %19 {offsets = [0, 0], sizes = [8, 128], strides = [1, 1]} : vector<8x512xf32> to vector<8x128xf32>
    %21 = arith.negf %20 : vector<8x128xf32>
    %22 = math.exp %21 : vector<8x128xf32>
    %cst_20 = arith.constant 1.000000e+00 : f32
    %23 = vector.broadcast %cst_20 : f32 to vector<8x128xf32>
    %24 = arith.addf %23, %22 : vector<8x128xf32>
    %25 = arith.divf %23, %24 : vector<8x128xf32>
    %26 = vector.extract_strided_slice %19 {offsets = [0, 128], sizes = [8, 128], strides = [1, 1]} : vector<8x512xf32> to vector<8x128xf32>
    %27 = arith.negf %26 : vector<8x128xf32>
    %28 = math.exp %27 : vector<8x128xf32>
    %cst_21 = arith.constant 1.000000e+00 : f32
    %29 = vector.broadcast %cst_21 : f32 to vector<8x128xf32>
    %30 = arith.addf %29, %28 : vector<8x128xf32>
    %31 = arith.divf %29, %30 : vector<8x128xf32>
    %32 = vector.extract_strided_slice %19 {offsets = [0, 256], sizes = [8, 128], strides = [1, 1]} : vector<8x512xf32> to vector<8x128xf32>
    %33 = math.tanh %32 : vector<8x128xf32>
    %34 = vector.extract_strided_slice %19 {offsets = [0, 384], sizes = [8, 128], strides = [1, 1]} : vector<8x512xf32> to vector<8x128xf32>
    %35 = arith.negf %34 : vector<8x128xf32>
    %36 = math.exp %35 : vector<8x128xf32>
    %cst_22 = arith.constant 1.000000e+00 : f32
    %37 = vector.broadcast %cst_22 : f32 to vector<8x128xf32>
    %38 = arith.addf %37, %36 : vector<8x128xf32>
    %39 = arith.divf %37, %38 : vector<8x128xf32>
    %40 = arith.mulf %31, %14 : vector<8x128xf32>
    %41 = arith.mulf %25, %33 : vector<8x128xf32>
    %42 = arith.addf %40, %41 : vector<8x128xf32>
    %43 = math.tanh %42 : vector<8x128xf32>
    %44 = arith.mulf %39, %43 : vector<8x128xf32>
    %45 = arith.index_cast %c0_i32_16 : i32 to index
    %c0_23 = arith.constant 0 : index
    %c0_24 = arith.constant 0 : index
    %46 = vector.load %arg11[%45, %c0_23, %c0_24] : memref<8x8x128xf32, #tpu.memory_space<vmem>>, vector<1x8x128xf32>
    %47 = vector.shape_cast %46 : vector<1x8x128xf32> to vector<8x128xf32>
    %48 = vector.shape_cast %44 : vector<8x128xf32> to vector<1x8x128xf32>
    tpu.vector_store %arg11[%45, %c0_23, %c0_24], %48 {strides = array<i32>} : memref<8x8x128xf32, #tpu.memory_space<vmem>>, vector<1x8x128xf32>,
    %c1_i32 = arith.constant 1 : i32
    %49 = arith.index_cast %c1_i32 : i32 to index
    %c0_25 = arith.constant 0 : index
    %c0_26 = arith.constant 0 : index
    %50 = vector.load %arg10[%49, %c0_25, %c0_26] : memref<8x8x512xf32, #tpu.memory_space<vmem>>, vector<1x8x512xf32>
    %51 = vector.shape_cast %50 : vector<1x8x512xf32> to vector<8x512xf32>
    %cst_27 = arith.constant dense<0.000000e+00> : vector<8x512xf32>
    %52 = tpu.matmul %44, %12, %cst_27 {dimension_numbers = #tpu.dot_dimension_numbers<[1], [0], [0], [1], [0, 0, 1, 1], [], []>} : vector<8x128xf32>, vector<128x512xf32>, vector<8x512xf32> -> vector<8x512xf32>
    %53 = arith.addf %51, %52 : vector<8x512xf32>
    %54 = vector.extract_strided_slice %53 {offsets = [0, 0], sizes = [8, 128], strides = [1, 1]} : vector<8x512xf32> to vector<8x128xf32>
    %55 = arith.negf %54 : vector<8x128xf32>
    %56 = math.exp %55 : vector<8x128xf32>
    %cst_28 = arith.constant 1.000000e+00 : f32
    %57 = vector.broadcast %cst_28 : f32 to vector<8x128xf32>
    %58 = arith.addf %57, %56 : vector<8x128xf32>
    %59 = arith.divf %57, %58 : vector<8x128xf32>
    %60 = vector.extract_strided_slice %53 {offsets = [0, 128], sizes = [8, 128], strides = [1, 1]} : vector<8x512xf32> to vector<8x128xf32>
    %61 = arith.negf %60 : vector<8x128xf32>
    %62 = math.exp %61 : vector<8x128xf32>
    %cst_29 = arith.constant 1.000000e+00 : f32
    %63 = vector.broadcast %cst_29 : f32 to vector<8x128xf32>
    %64 = arith.addf %63, %62 : vector<8x128xf32>
    %65 = arith.divf %63, %64 : vector<8x128xf32>
    %66 = vector.extract_strided_slice %53 {offsets = [0, 256], sizes = [8, 128], strides = [1, 1]} : vector<8x512xf32> to vector<8x128xf32>
    %67 = math.tanh %66 : vector<8x128xf32>
    %68 = vector.extract_strided_slice %53 {offsets = [0, 384], sizes = [8, 128], strides = [1, 1]} : vector<8x512xf32> to vector<8x128xf32>
    %69 = arith.negf %68 : vector<8x128xf32>
    %70 = math.exp %69 : vector<8x128xf32>
    %cst_30 = arith.constant 1.000000e+00 : f32
    %71 = vector.broadcast %cst_30 : f32 to vector<8x128xf32>
    %72 = arith.addf %71, %70 : vector<8x128xf32>
    %73 = arith.divf %71, %72 : vector<8x128xf32>
    %74 = arith.mulf %65, %42 : vector<8x128xf32>
    %75 = arith.mulf %59, %67 : vector<8x128xf32>
    %76 = arith.addf %74, %75 : vector<8x128xf32>
    %77 = math.tanh %76 : vector<8x128xf32>
    %78 = arith.mulf %73, %77 : vector<8x128xf32>
    %79 = arith.index_cast %c1_i32 : i32 to index
    %c0_31 = arith.constant 0 : index
    %c0_32 = arith.constant 0 : index
    %80 = vector.load %arg11[%79, %c0_31, %c0_32] : memref<8x8x128xf32, #tpu.memory_space<vmem>>, vector<1x8x128xf32>
    %81 = vector.shape_cast %80 : vector<1x8x128xf32> to vector<8x128xf32>
    %82 = vector.shape_cast %78 : vector<8x128xf32> to vector<1x8x128xf32>
    tpu.vector_store %arg11[%79, %c0_31, %c0_32], %82 {strides = array<i32>} : memref<8x8x128xf32, #tpu.memory_space<vmem>>, vector<1x8x128xf32>,
    %c2_i32 = arith.constant 2 : i32
    %83 = arith.index_cast %c2_i32 : i32 to index
    %c0_33 = arith.constant 0 : index
    %c0_34 = arith.constant 0 : index
    %84 = vector.load %arg10[%83, %c0_33, %c0_34] : memref<8x8x512xf32, #tpu.memory_space<vmem>>, vector<1x8x512xf32>
    %85 = vector.shape_cast %84 : vector<1x8x512xf32> to vector<8x512xf32>
    %cst_35 = arith.constant dense<0.000000e+00> : vector<8x512xf32>
    %86 = tpu.matmul %78, %12, %cst_35 {dimension_numbers = #tpu.dot_dimension_numbers<[1], [0], [0], [1], [0, 0, 1, 1], [], []>} : vector<8x128xf32>, vector<128x512xf32>, vector<8x512xf32> -> vector<8x512xf32>
    %87 = arith.addf %85, %86 : vector<8x512xf32>
    %88 = vector.extract_strided_slice %87 {offsets = [0, 0], sizes = [8, 128], strides = [1, 1]} : vector<8x512xf32> to vector<8x128xf32>
    %89 = arith.negf %88 : vector<8x128xf32>
    %90 = math.exp %89 : vector<8x128xf32>
    %cst_36 = arith.constant 1.000000e+00 : f32
    %91 = vector.broadcast %cst_36 : f32 to vector<8x128xf32>
    %92 = arith.addf %91, %90 : vector<8x128xf32>
    %93 = arith.divf %91, %92 : vector<8x128xf32>
    %94 = vector.extract_strided_slice %87 {offsets = [0, 128], sizes = [8, 128], strides = [1, 1]} : vector<8x512xf32> to vector<8x128xf32>
    %95 = arith.negf %94 : vector<8x128xf32>
    %96 = math.exp %95 : vector<8x128xf32>
    %cst_37 = arith.constant 1.000000e+00 : f32
    %97 = vector.broadcast %cst_37 : f32 to vector<8x128xf32>
    %98 = arith.addf %97, %96 : vector<8x128xf32>
    %99 = arith.divf %97, %98 : vector<8x128xf32>
    %100 = vector.extract_strided_slice %87 {offsets = [0, 256], sizes = [8, 128], strides = [1, 1]} : vector<8x512xf32> to vector<8x128xf32>
    %101 = math.tanh %100 : vector<8x128xf32>
    %102 = vector.extract_strided_slice %87 {offsets = [0, 384], sizes = [8, 128], strides = [1, 1]} : vector<8x512xf32> to vector<8x128xf32>
    %103 = arith.negf %102 : vector<8x128xf32>
    %104 = math.exp %103 : vector<8x128xf32>
    %cst_38 = arith.constant 1.000000e+00 : f32
    %105 = vector.broadcast %cst_38 : f32 to vector<8x128xf32>
    %106 = arith.addf %105, %104 : vector<8x128xf32>
    %107 = arith.divf %105, %106 : vector<8x128xf32>
    %108 = arith.mulf %99, %76 : vector<8x128xf32>
    %109 = arith.mulf %93, %101 : vector<8x128xf32>
    %110 = arith.addf %108, %109 : vector<8x128xf32>
    %111 = math.tanh %110 : vector<8x128xf32>
    %112 = arith.mulf %107, %111 : vector<8x128xf32>
    %113 = arith.index_cast %c2_i32 : i32 to index
    %c0_39 = arith.constant 0 : index
    %c0_40 = arith.constant 0 : index
    %114 = vector.load %arg11[%113, %c0_39, %c0_40] : memref<8x8x128xf32, #tpu.memory_space<vmem>>, vector<1x8x128xf32>
    %115 = vector.shape_cast %114 : vector<1x8x128xf32> to vector<8x128xf32>
    %116 = vector.shape_cast %112 : vector<8x128xf32> to vector<1x8x128xf32>
    tpu.vector_store %arg11[%113, %c0_39, %c0_40], %116 {strides = array<i32>} : memref<8x8x128xf32, #tpu.memory_space<vmem>>, vector<1x8x128xf32>,
    %c3_i32 = arith.constant 3 : i32
    %117 = arith.index_cast %c3_i32 : i32 to index
    %c0_41 = arith.constant 0 : index
    %c0_42 = arith.constant 0 : index
    %118 = vector.load %arg10[%117, %c0_41, %c0_42] : memref<8x8x512xf32, #tpu.memory_space<vmem>>, vector<1x8x512xf32>
    %119 = vector.shape_cast %118 : vector<1x8x512xf32> to vector<8x512xf32>
    %cst_43 = arith.constant dense<0.000000e+00> : vector<8x512xf32>
    %120 = tpu.matmul %112, %12, %cst_43 {dimension_numbers = #tpu.dot_dimension_numbers<[1], [0], [0], [1], [0, 0, 1, 1], [], []>} : vector<8x128xf32>, vector<128x512xf32>, vector<8x512xf32> -> vector<8x512xf32>
    %121 = arith.addf %119, %120 : vector<8x512xf32>
    %122 = vector.extract_strided_slice %121 {offsets = [0, 0], sizes = [8, 128], strides = [1, 1]} : vector<8x512xf32> to vector<8x128xf32>
    %123 = arith.negf %122 : vector<8x128xf32>
    %124 = math.exp %123 : vector<8x128xf32>
    %cst_44 = arith.constant 1.000000e+00 : f32
    %125 = vector.broadcast %cst_44 : f32 to vector<8x128xf32>
    %126 = arith.addf %125, %124 : vector<8x128xf32>
    %127 = arith.divf %125, %126 : vector<8x128xf32>
    %128 = vector.extract_strided_slice %121 {offsets = [0, 128], sizes = [8, 128], strides = [1, 1]} : vector<8x512xf32> to vector<8x128xf32>
    %129 = arith.negf %128 : vector<8x128xf32>
    %130 = math.exp %129 : vector<8x128xf32>
    %cst_45 = arith.constant 1.000000e+00 : f32
    %131 = vector.broadcast %cst_45 : f32 to vector<8x128xf32>
    %132 = arith.addf %131, %130 : vector<8x128xf32>
    %133 = arith.divf %131, %132 : vector<8x128xf32>
    %134 = vector.extract_strided_slice %121 {offsets = [0, 256], sizes = [8, 128], strides = [1, 1]} : vector<8x512xf32> to vector<8x128xf32>
    %135 = math.tanh %134 : vector<8x128xf32>
    %136 = vector.extract_strided_slice %121 {offsets = [0, 384], sizes = [8, 128], strides = [1, 1]} : vector<8x512xf32> to vector<8x128xf32>
    %137 = arith.negf %136 : vector<8x128xf32>
    %138 = math.exp %137 : vector<8x128xf32>
    %cst_46 = arith.constant 1.000000e+00 : f32
    %139 = vector.broadcast %cst_46 : f32 to vector<8x128xf32>
    %140 = arith.addf %139, %138 : vector<8x128xf32>
    %141 = arith.divf %139, %140 : vector<8x128xf32>
    %142 = arith.mulf %133, %110 : vector<8x128xf32>
    %143 = arith.mulf %127, %135 : vector<8x128xf32>
    %144 = arith.addf %142, %143 : vector<8x128xf32>
    %145 = math.tanh %144 : vector<8x128xf32>
    %146 = arith.mulf %141, %145 : vector<8x128xf32>
    %147 = arith.index_cast %c3_i32 : i32 to index
    %c0_47 = arith.constant 0 : index
    %c0_48 = arith.constant 0 : index
    %148 = vector.load %arg11[%147, %c0_47, %c0_48] : memref<8x8x128xf32, #tpu.memory_space<vmem>>, vector<1x8x128xf32>
    %149 = vector.shape_cast %148 : vector<1x8x128xf32> to vector<8x128xf32>
    %150 = vector.shape_cast %146 : vector<8x128xf32> to vector<1x8x128xf32>
    tpu.vector_store %arg11[%147, %c0_47, %c0_48], %150 {strides = array<i32>} : memref<8x8x128xf32, #tpu.memory_space<vmem>>, vector<1x8x128xf32>,
    %c4_i32 = arith.constant 4 : i32
    %151 = arith.index_cast %c4_i32 : i32 to index
    %c0_49 = arith.constant 0 : index
    %c0_50 = arith.constant 0 : index
    %152 = vector.load %arg10[%151, %c0_49, %c0_50] : memref<8x8x512xf32, #tpu.memory_space<vmem>>, vector<1x8x512xf32>
    %153 = vector.shape_cast %152 : vector<1x8x512xf32> to vector<8x512xf32>
    %cst_51 = arith.constant dense<0.000000e+00> : vector<8x512xf32>
    %154 = tpu.matmul %146, %12, %cst_51 {dimension_numbers = #tpu.dot_dimension_numbers<[1], [0], [0], [1], [0, 0, 1, 1], [], []>} : vector<8x128xf32>, vector<128x512xf32>, vector<8x512xf32> -> vector<8x512xf32>
    %155 = arith.addf %153, %154 : vector<8x512xf32>
    %156 = vector.extract_strided_slice %155 {offsets = [0, 0], sizes = [8, 128], strides = [1, 1]} : vector<8x512xf32> to vector<8x128xf32>
    %157 = arith.negf %156 : vector<8x128xf32>
    %158 = math.exp %157 : vector<8x128xf32>
    %cst_52 = arith.constant 1.000000e+00 : f32
    %159 = vector.broadcast %cst_52 : f32 to vector<8x128xf32>
    %160 = arith.addf %159, %158 : vector<8x128xf32>
    %161 = arith.divf %159, %160 : vector<8x128xf32>
    %162 = vector.extract_strided_slice %155 {offsets = [0, 128], sizes = [8, 128], strides = [1, 1]} : vector<8x512xf32> to vector<8x128xf32>
    %163 = arith.negf %162 : vector<8x128xf32>
    %164 = math.exp %163 : vector<8x128xf32>
    %cst_53 = arith.constant 1.000000e+00 : f32
    %165 = vector.broadcast %cst_53 : f32 to vector<8x128xf32>
    %166 = arith.addf %165, %164 : vector<8x128xf32>
    %167 = arith.divf %165, %166 : vector<8x128xf32>
    %168 = vector.extract_strided_slice %155 {offsets = [0, 256], sizes = [8, 128], strides = [1, 1]} : vector<8x512xf32> to vector<8x128xf32>
    %169 = math.tanh %168 : vector<8x128xf32>
    %170 = vector.extract_strided_slice %155 {offsets = [0, 384], sizes = [8, 128], strides = [1, 1]} : vector<8x512xf32> to vector<8x128xf32>
    %171 = arith.negf %170 : vector<8x128xf32>
    %172 = math.exp %171 : vector<8x128xf32>
    %cst_54 = arith.constant 1.000000e+00 : f32
    %173 = vector.broadcast %cst_54 : f32 to vector<8x128xf32>
    %174 = arith.addf %173, %172 : vector<8x128xf32>
    %175 = arith.divf %173, %174 : vector<8x128xf32>
    %176 = arith.mulf %167, %144 : vector<8x128xf32>
    %177 = arith.mulf %161, %169 : vector<8x128xf32>
    %178 = arith.addf %176, %177 : vector<8x128xf32>
    %179 = math.tanh %178 : vector<8x128xf32>
    %180 = arith.mulf %175, %179 : vector<8x128xf32>
    %181 = arith.index_cast %c4_i32 : i32 to index
    %c0_55 = arith.constant 0 : index
    %c0_56 = arith.constant 0 : index
    %182 = vector.load %arg11[%181, %c0_55, %c0_56] : memref<8x8x128xf32, #tpu.memory_space<vmem>>, vector<1x8x128xf32>
    %183 = vector.shape_cast %182 : vector<1x8x128xf32> to vector<8x128xf32>
    %184 = vector.shape_cast %180 : vector<8x128xf32> to vector<1x8x128xf32>
    tpu.vector_store %arg11[%181, %c0_55, %c0_56], %184 {strides = array<i32>} : memref<8x8x128xf32, #tpu.memory_space<vmem>>, vector<1x8x128xf32>,
    %c5_i32 = arith.constant 5 : i32
    %185 = arith.index_cast %c5_i32 : i32 to index
    %c0_57 = arith.constant 0 : index
    %c0_58 = arith.constant 0 : index
    %186 = vector.load %arg10[%185, %c0_57, %c0_58] : memref<8x8x512xf32, #tpu.memory_space<vmem>>, vector<1x8x512xf32>
    %187 = vector.shape_cast %186 : vector<1x8x512xf32> to vector<8x512xf32>
    %cst_59 = arith.constant dense<0.000000e+00> : vector<8x512xf32>
    %188 = tpu.matmul %180, %12, %cst_59 {dimension_numbers = #tpu.dot_dimension_numbers<[1], [0], [0], [1], [0, 0, 1, 1], [], []>} : vector<8x128xf32>, vector<128x512xf32>, vector<8x512xf32> -> vector<8x512xf32>
    %189 = arith.addf %187, %188 : vector<8x512xf32>
    %190 = vector.extract_strided_slice %189 {offsets = [0, 0], sizes = [8, 128], strides = [1, 1]} : vector<8x512xf32> to vector<8x128xf32>
    %191 = arith.negf %190 : vector<8x128xf32>
    %192 = math.exp %191 : vector<8x128xf32>
    %cst_60 = arith.constant 1.000000e+00 : f32
    %193 = vector.broadcast %cst_60 : f32 to vector<8x128xf32>
    %194 = arith.addf %193, %192 : vector<8x128xf32>
    %195 = arith.divf %193, %194 : vector<8x128xf32>
    %196 = vector.extract_strided_slice %189 {offsets = [0, 128], sizes = [8, 128], strides = [1, 1]} : vector<8x512xf32> to vector<8x128xf32>
    %197 = arith.negf %196 : vector<8x128xf32>
    %198 = math.exp %197 : vector<8x128xf32>
    %cst_61 = arith.constant 1.000000e+00 : f32
    %199 = vector.broadcast %cst_61 : f32 to vector<8x128xf32>
    %200 = arith.addf %199, %198 : vector<8x128xf32>
    %201 = arith.divf %199, %200 : vector<8x128xf32>
    %202 = vector.extract_strided_slice %189 {offsets = [0, 256], sizes = [8, 128], strides = [1, 1]} : vector<8x512xf32> to vector<8x128xf32>
    %203 = math.tanh %202 : vector<8x128xf32>
    %204 = vector.extract_strided_slice %189 {offsets = [0, 384], sizes = [8, 128], strides = [1, 1]} : vector<8x512xf32> to vector<8x128xf32>
    %205 = arith.negf %204 : vector<8x128xf32>
    %206 = math.exp %205 : vector<8x128xf32>
    %cst_62 = arith.constant 1.000000e+00 : f32
    %207 = vector.broadcast %cst_62 : f32 to vector<8x128xf32>
    %208 = arith.addf %207, %206 : vector<8x128xf32>
    %209 = arith.divf %207, %208 : vector<8x128xf32>
    %210 = arith.mulf %201, %178 : vector<8x128xf32>
    %211 = arith.mulf %195, %203 : vector<8x128xf32>
    %212 = arith.addf %210, %211 : vector<8x128xf32>
    %213 = math.tanh %212 : vector<8x128xf32>
    %214 = arith.mulf %209, %213 : vector<8x128xf32>
    %215 = arith.index_cast %c5_i32 : i32 to index
    %c0_63 = arith.constant 0 : index
    %c0_64 = arith.constant 0 : index
    %216 = vector.load %arg11[%215, %c0_63, %c0_64] : memref<8x8x128xf32, #tpu.memory_space<vmem>>, vector<1x8x128xf32>
    %217 = vector.shape_cast %216 : vector<1x8x128xf32> to vector<8x128xf32>
    %218 = vector.shape_cast %214 : vector<8x128xf32> to vector<1x8x128xf32>
    tpu.vector_store %arg11[%215, %c0_63, %c0_64], %218 {strides = array<i32>} : memref<8x8x128xf32, #tpu.memory_space<vmem>>, vector<1x8x128xf32>,
    %c6_i32 = arith.constant 6 : i32
    %219 = arith.index_cast %c6_i32 : i32 to index
    %c0_65 = arith.constant 0 : index
    %c0_66 = arith.constant 0 : index
    %220 = vector.load %arg10[%219, %c0_65, %c0_66] : memref<8x8x512xf32, #tpu.memory_space<vmem>>, vector<1x8x512xf32>
    %221 = vector.shape_cast %220 : vector<1x8x512xf32> to vector<8x512xf32>
    %cst_67 = arith.constant dense<0.000000e+00> : vector<8x512xf32>
    %222 = tpu.matmul %214, %12, %cst_67 {dimension_numbers = #tpu.dot_dimension_numbers<[1], [0], [0], [1], [0, 0, 1, 1], [], []>} : vector<8x128xf32>, vector<128x512xf32>, vector<8x512xf32> -> vector<8x512xf32>
    %223 = arith.addf %221, %222 : vector<8x512xf32>
    %224 = vector.extract_strided_slice %223 {offsets = [0, 0], sizes = [8, 128], strides = [1, 1]} : vector<8x512xf32> to vector<8x128xf32>
    %225 = arith.negf %224 : vector<8x128xf32>
    %226 = math.exp %225 : vector<8x128xf32>
    %cst_68 = arith.constant 1.000000e+00 : f32
    %227 = vector.broadcast %cst_68 : f32 to vector<8x128xf32>
    %228 = arith.addf %227, %226 : vector<8x128xf32>
    %229 = arith.divf %227, %228 : vector<8x128xf32>
    %230 = vector.extract_strided_slice %223 {offsets = [0, 128], sizes = [8, 128], strides = [1, 1]} : vector<8x512xf32> to vector<8x128xf32>
    %231 = arith.negf %230 : vector<8x128xf32>
    %232 = math.exp %231 : vector<8x128xf32>
    %cst_69 = arith.constant 1.000000e+00 : f32
    %233 = vector.broadcast %cst_69 : f32 to vector<8x128xf32>
    %234 = arith.addf %233, %232 : vector<8x128xf32>
    %235 = arith.divf %233, %234 : vector<8x128xf32>
    %236 = vector.extract_strided_slice %223 {offsets = [0, 256], sizes = [8, 128], strides = [1, 1]} : vector<8x512xf32> to vector<8x128xf32>
    %237 = math.tanh %236 : vector<8x128xf32>
    %238 = vector.extract_strided_slice %223 {offsets = [0, 384], sizes = [8, 128], strides = [1, 1]} : vector<8x512xf32> to vector<8x128xf32>
    %239 = arith.negf %238 : vector<8x128xf32>
    %240 = math.exp %239 : vector<8x128xf32>
    %cst_70 = arith.constant 1.000000e+00 : f32
    %241 = vector.broadcast %cst_70 : f32 to vector<8x128xf32>
    %242 = arith.addf %241, %240 : vector<8x128xf32>
    %243 = arith.divf %241, %242 : vector<8x128xf32>
    %244 = arith.mulf %235, %212 : vector<8x128xf32>
    %245 = arith.mulf %229, %237 : vector<8x128xf32>
    %246 = arith.addf %244, %245 : vector<8x128xf32>
    %247 = math.tanh %246 : vector<8x128xf32>
    %248 = arith.mulf %243, %247 : vector<8x128xf32>
    %249 = arith.index_cast %c6_i32 : i32 to index
    %c0_71 = arith.constant 0 : index
    %c0_72 = arith.constant 0 : index
    %250 = vector.load %arg11[%249, %c0_71, %c0_72] : memref<8x8x128xf32, #tpu.memory_space<vmem>>, vector<1x8x128xf32>
    %251 = vector.shape_cast %250 : vector<1x8x128xf32> to vector<8x128xf32>
    %252 = vector.shape_cast %248 : vector<8x128xf32> to vector<1x8x128xf32>
    tpu.vector_store %arg11[%249, %c0_71, %c0_72], %252 {strides = array<i32>} : memref<8x8x128xf32, #tpu.memory_space<vmem>>, vector<1x8x128xf32>,
    %c7_i32 = arith.constant 7 : i32
    %253 = arith.index_cast %c7_i32 : i32 to index
    %c0_73 = arith.constant 0 : index
    %c0_74 = arith.constant 0 : index
    %254 = vector.load %arg10[%253, %c0_73, %c0_74] : memref<8x8x512xf32, #tpu.memory_space<vmem>>, vector<1x8x512xf32>
    %255 = vector.shape_cast %254 : vector<1x8x512xf32> to vector<8x512xf32>
    %cst_75 = arith.constant dense<0.000000e+00> : vector<8x512xf32>
    %256 = tpu.matmul %248, %12, %cst_75 {dimension_numbers = #tpu.dot_dimension_numbers<[1], [0], [0], [1], [0, 0, 1, 1], [], []>} : vector<8x128xf32>, vector<128x512xf32>, vector<8x512xf32> -> vector<8x512xf32>
    %257 = arith.addf %255, %256 : vector<8x512xf32>
    %258 = vector.extract_strided_slice %257 {offsets = [0, 0], sizes = [8, 128], strides = [1, 1]} : vector<8x512xf32> to vector<8x128xf32>
    %259 = arith.negf %258 : vector<8x128xf32>
    %260 = math.exp %259 : vector<8x128xf32>
    %cst_76 = arith.constant 1.000000e+00 : f32
    %261 = vector.broadcast %cst_76 : f32 to vector<8x128xf32>
    %262 = arith.addf %261, %260 : vector<8x128xf32>
    %263 = arith.divf %261, %262 : vector<8x128xf32>
    %264 = vector.extract_strided_slice %257 {offsets = [0, 128], sizes = [8, 128], strides = [1, 1]} : vector<8x512xf32> to vector<8x128xf32>
    %265 = arith.negf %264 : vector<8x128xf32>
    %266 = math.exp %265 : vector<8x128xf32>
    %cst_77 = arith.constant 1.000000e+00 : f32
    %267 = vector.broadcast %cst_77 : f32 to vector<8x128xf32>
    %268 = arith.addf %267, %266 : vector<8x128xf32>
    %269 = arith.divf %267, %268 : vector<8x128xf32>
    %270 = vector.extract_strided_slice %257 {offsets = [0, 256], sizes = [8, 128], strides = [1, 1]} : vector<8x512xf32> to vector<8x128xf32>
    %271 = math.tanh %270 : vector<8x128xf32>
    %272 = vector.extract_strided_slice %257 {offsets = [0, 384], sizes = [8, 128], strides = [1, 1]} : vector<8x512xf32> to vector<8x128xf32>
    %273 = arith.negf %272 : vector<8x128xf32>
    %274 = math.exp %273 : vector<8x128xf32>
    %cst_78 = arith.constant 1.000000e+00 : f32
    %275 = vector.broadcast %cst_78 : f32 to vector<8x128xf32>
    %276 = arith.addf %275, %274 : vector<8x128xf32>
    %277 = arith.divf %275, %276 : vector<8x128xf32>
    %278 = arith.mulf %269, %246 : vector<8x128xf32>
    %279 = arith.mulf %263, %271 : vector<8x128xf32>
    %280 = arith.addf %278, %279 : vector<8x128xf32>
    %281 = math.tanh %280 : vector<8x128xf32>
    %282 = arith.mulf %277, %281 : vector<8x128xf32>
    %283 = arith.index_cast %c7_i32 : i32 to index
    %c0_79 = arith.constant 0 : index
    %c0_80 = arith.constant 0 : index
    %284 = vector.load %arg11[%283, %c0_79, %c0_80] : memref<8x8x128xf32, #tpu.memory_space<vmem>>, vector<1x8x128xf32>
    %285 = vector.shape_cast %284 : vector<1x8x128xf32> to vector<8x128xf32>
    %286 = vector.shape_cast %282 : vector<8x128xf32> to vector<1x8x128xf32>
    tpu.vector_store %arg11[%283, %c0_79, %c0_80], %286 {strides = array<i32>} : memref<8x8x128xf32, #tpu.memory_space<vmem>>, vector<1x8x128xf32>,
    %c8_i32 = arith.constant 8 : i32
    %c0_81 = arith.constant 0 : index
    %c0_82 = arith.constant 0 : index
    %287 = vector.load %arg8[%c0_81, %c0_82] : memref<8x128xf32, #tpu.memory_space<vmem>>, vector<8x128xf32>
    tpu.vector_store %arg8[%c0_81, %c0_82], %282 {strides = array<i32>} : memref<8x128xf32, #tpu.memory_space<vmem>>, vector<8x128xf32>,
    %c0_83 = arith.constant 0 : index
    %c0_84 = arith.constant 0 : index
    %288 = vector.load %arg9[%c0_83, %c0_84] : memref<8x128xf32, #tpu.memory_space<vmem>>, vector<8x128xf32>
    tpu.vector_store %arg9[%c0_83, %c0_84], %280 {strides = array<i32>} : memref<8x128xf32, #tpu.memory_space<vmem>>, vector<8x128xf32>,
    %c0_85 = arith.constant 0 : index
    %c0_86 = arith.constant 0 : index
    %c0_87 = arith.constant 0 : index
    %289 = vector.load %arg11[%c0_85, %c0_86, %c0_87] : memref<8x8x128xf32, #tpu.memory_space<vmem>>, vector<8x8x128xf32>
    %290 = vector.shape_cast %289 : vector<8x8x128xf32> to vector<64x128xf32>
    %c0_88 = arith.constant 0 : index
    %c0_89 = arith.constant 0 : index
    %291 = vector.load %arg5[%c0_88, %c0_89] : memref<128x128xf32, #tpu.memory_space<vmem>>, vector<128x128xf32>
    %cst_90 = arith.constant dense<0.000000e+00> : vector<64x128xf32>
    %292 = tpu.matmul %290, %291, %cst_90 {dimension_numbers = #tpu.dot_dimension_numbers<[1], [0], [0], [1], [0, 0, 1, 1], [], []>} : vector<64x128xf32>, vector<128x128xf32>, vector<64x128xf32> -> vector<64x128xf32>
    %c0_91 = arith.constant 0 : index
    %c0_92 = arith.constant 0 : index
    %293 = vector.load %arg6[%c0_91, %c0_92] : memref<1x128xf32, #tpu.memory_space<vmem>>, vector<1x128xf32>
    %294 = vector.broadcast %293 : vector<1x128xf32> to vector<64x128xf32>
    %295 = arith.addf %292, %294 : vector<64x128xf32>
    %c0_93 = arith.constant 0 : index
    %c0_94 = arith.constant 0 : index
    %c0_95 = arith.constant 0 : index
    %296 = vector.load %arg1[%c0_93, %c0_94, %c0_95] : memref<8x8x128xf32, #tpu.memory_space<vmem>>, vector<8x8x128xf32>
    %297 = vector.shape_cast %296 : vector<8x8x128xf32> to vector<64x128xf32>
    %298 = arith.addf %297, %295 : vector<64x128xf32>
    %cst_96 = arith.constant 0.000000e+00 : f32
    %299 = vector.broadcast %cst_96 : f32 to vector<64x128xf32>
    %300 = arith.maximumf %298, %299 : vector<64x128xf32>
    %301 = vector.shape_cast %300 : vector<64x128xf32> to vector<8x8x128xf32>
    %c0_97 = arith.constant 0 : index
    %c0_98 = arith.constant 0 : index
    %c0_99 = arith.constant 0 : index
    %302 = vector.load %arg7[%c0_97, %c0_98, %c0_99] : memref<8x8x128xf32, #tpu.memory_space<vmem>>, vector<8x8x128xf32>
    tpu.vector_store %arg7[%c0_97, %c0_98, %c0_99], %301 {strides = array<i32>} : memref<8x8x128xf32, #tpu.memory_space<vmem>>, vector<8x8x128xf32>,
    return
  }
  func.func @transform_0(%arg0: i32) -> (i32, i32, i32) {
    %c0_i32 = arith.constant 0 : i32
    %c0_i32_0 = arith.constant 0 : i32
    %c0_i32_1 = arith.constant 0 : i32
    return %arg0, %c0_i32, %c0_i32_0 : i32, i32, i32
  }
  func.func @transform_1(%arg0: i32) -> (i32, i32) {
    %c0_i32 = arith.constant 0 : i32
    %c0_i32_0 = arith.constant 0 : i32
    %c0_i32_1 = arith.constant 0 : i32
    return %c0_i32, %c0_i32_0 : i32, i32
  }
  func.func @transform_2(%arg0: i32) -> (i32, i32) {
    %c0_i32 = arith.constant 0 : i32
    %c0_i32_0 = arith.constant 0 : i32
    %c0_i32_1 = arith.constant 0 : i32
    return %c0_i32, %c0_i32_0 : i32, i32
  }
  func.func @transform_3(%arg0: i32) -> (i32, i32) {
    %c0_i32 = arith.constant 0 : i32
    %c0_i32_0 = arith.constant 0 : i32
    %c0_i32_1 = arith.constant 0 : i32
    return %c0_i32, %c0_i32_0 : i32, i32
  }
  func.func @transform_4(%arg0: i32) -> (i32, i32) {
    %c0_i32 = arith.constant 0 : i32
    %c0_i32_0 = arith.constant 0 : i32
    %c0_i32_1 = arith.constant 0 : i32
    return %c0_i32, %c0_i32_0 : i32, i32
  }
  func.func @transform_5(%arg0: i32) -> (i32, i32) {
    %c0_i32 = arith.constant 0 : i32
    %c0_i32_0 = arith.constant 0 : i32
    %c0_i32_1 = arith.constant 0 : i32
    return %c0_i32, %c0_i32_0 : i32, i32
  }
  func.func @transform_6(%arg0: i32) -> (i32, i32, i32) {
    %c0_i32 = arith.constant 0 : i32
    %c0_i32_0 = arith.constant 0 : i32
    %c0_i32_1 = arith.constant 0 : i32
    return %arg0, %c0_i32, %c0_i32_0 : i32, i32, i32
  }
}

</mosaic_0001>

<bundles_post_ra>
// kernel: tpu_custom_call.1
= control target key start
LH: loop header
LB: loop body
LE: loop exit
PB: predicated region body
PF: predicated region fallthrough
CT: control target
= control target key end

     0   :  { %11 = vsyncpa [#allocation7], 0  ;;  %s3766_s0 = inlined_call_operand.hbm [shape: f32[8,8,128], index: 0, kind: input, shape index: {}]   ;;  %s3767_s1 = inlined_call_operand.hbm [shape: f32[128,512], index: 1, kind: input, shape index: {}]   ;;  %s3768_s2 = inlined_call_operand.hbm [shape: f32[128,512], index: 2, kind: input, shape index: {}]   ;;  %s3769_s3 = inlined_call_operand.vmem [shape: f32[1,512], index: 3, kind: input, shape index: {}]   ;;  %s3770_s4 = inlined_call_operand.hbm [shape: f32[128,128], index: 4, kind: input, shape index: {}]   ;;  %s3771_s5 = inlined_call_operand.vmem [shape: f32[1,128], index: 5, kind: input, shape index: {}]   ;;  %s3772_s6 = inlined_call_operand.hbm [shape: f32[8,8,128], index: 6, kind: output, shape index: {}]  }
   0x1   :  { %12 = vsyncpa [#allocation10], 0 }
   0x2   :  { %13 = vsyncpa [#allocation13], 0 }
   0x3   :  { %14 = vsyncpa [#allocation8], 0  ;;  %s3127_s21 = smov [#allocation9]   ;;  %s3009_s25 = scalar_lea.hbm %s3767_s1, 8192 }
   0x4   :  { %s32_s22 = sshll.u32 %s3127_s21, 4  ;;  %p3010_p0 = scmp.ne.s32.totalorder %s3767_s1, %s3009_s25  ;;  %s33_s22 = int_to_ptr.vmem [resolvable:$true] %s32_s22 }
   0x5   :  { %p3013_p1 = scmp.lt.u32.totalorder %s3009_s25, %s3767_s1 }
   0x7   :  { %p3015_p2 = pnand %p3013_p1, %p3010_p0 }
   0x9   :  { %3018 = shalt.err (!%p3015_p2)
}
   0xa   :  { %s3019_s30 = scalar_lea.vmem %s33_s22, 8192  ;;  %p3024_p4 = scmp.lt.s32.totalorder %s33_s22, %s33_s22 }
   0xb   :  { %p3020_p3 = scmp.ne.s32.totalorder %s33_s22, %s3019_s30  ;;  %p3025_p5 = scmp.lt.s32.totalorder %s3019_s30, %s3019_s30 }
   0xd   :  { %p3026_p6 = por %p3025_p5, %p3024_p4 }
   0xf   :  { %p3027_p7 = pnand %p3026_p6, %p3020_p3 }
  0x11   :  { %3030 = shalt.err (!%p3027_p7)
}
  0x12   :  { %s3128_s7 = smov 512   ;;  %s3129_s8 = smov 32  }
  0x13   :  { %38 = dma.hbm_to_vmem [thread:$0]  %s3767_s1, 8192, %s33_s22, [#allocation10], %s3128_s7, %s3128_s7, %s3129_s8  }
  0x14   :  { %s3130_s11 = smov [#allocation6]   ;;  %s3031_s15 = scalar_lea.hbm %s3766_s0, 1024 }
  0x15   :  { %s20_s12 = sshll.u32 %s3130_s11, 4  ;;  %p3032_p8 = scmp.ne.s32.totalorder %s3766_s0, %s3031_s15  ;;  %s21_s12 = int_to_ptr.vmem [resolvable:$true] %s20_s12 }
  0x16   :  { %p3035_p9 = scmp.lt.u32.totalorder %s3031_s15, %s3766_s0 }
  0x18   :  { %p3037_p10 = pnand %p3035_p9, %p3032_p8 }
  0x1a   :  { %3040 = shalt.err (!%p3037_p10)
}
  0x1b   :  { %s3041_s20 = scalar_lea.vmem %s21_s12, 1024  ;;  %p3046_p12 = scmp.lt.s32.totalorder %s21_s12, %s21_s12 }
  0x1c   :  { %p3042_p11 = scmp.ne.s32.totalorder %s21_s12, %s3041_s20  ;;  %p3047_p13 = scmp.lt.s32.totalorder %s3041_s20, %s3041_s20 }
  0x1e   :  { %p3048_p0 = por %p3047_p13, %p3046_p12 }
  0x20   :  { %p3049_p1 = pnand %p3048_p0, %p3042_p11 }
  0x22   :  { %3052 = shalt.err (!%p3049_p1)
}
  0x23   :  { %s3131_s1 = smov 128   ;;  %s3132_s21 = smov 8  }
  0x24   :  { %26 = dma.hbm_to_vmem [thread:$0]  %s3766_s0, 1024, %s21_s12, [#allocation7], %s3131_s1, %s3131_s1, %s3132_s21  }
  0x25   :  { %s3133_s24 = smov [#allocation11]   ;;  %s3134_s26 = smov [#allocation12]  }
  0x26   :  { %s44_s25 = sshll.u32 %s3133_s24, 4  ;;  %s58_s27 = sshll.u32 %s3134_s26, 4  ;;  %s45_s25 = int_to_ptr.vmem [resolvable:$true] %s44_s25  ;;  %s3202_s27 = int_to_ptr.vmem [resolvable:$true] %s58_s27 }
  0x27   :  { %s3053_s30 = scalar_lea.hbm %s3768_s2, 8192 }
  0x28   :  { %p3054_p2 = scmp.ne.s32.totalorder %s3768_s2, %s3053_s30  ;;  %p3057_p3 = scmp.lt.u32.totalorder %s3053_s30, %s3768_s2 }
  0x2a   :  { %p3059_p4 = pnand %p3057_p3, %p3054_p2 }
  0x2c   :  { %3062 = shalt.err (!%p3059_p4)
}
  0x2d   :  { %s3063_s0 = scalar_lea.vmem %s45_s25, 8192  ;;  %p3068_p6 = scmp.lt.s32.totalorder %s45_s25, %s45_s25 }
  0x2e   :  { %p3064_p5 = scmp.ne.s32.totalorder %s45_s25, %s3063_s0  ;;  %p3069_p7 = scmp.lt.s32.totalorder %s3063_s0, %s3063_s0 }
  0x30   :  { %p3070_p8 = por %p3069_p7, %p3068_p6 }
  0x32   :  { %p3071_p9 = pnand %p3070_p8, %p3064_p5 }
  0x34   :  { %3074 = shalt.err (!%p3071_p9)
}
  0x35   :  { %50 = dma.hbm_to_vmem [thread:$0]  %s3768_s2, 8192, %s45_s25, [#allocation10], %s3128_s7, %s3128_s7, %s3129_s8  }
  0x36   :  { %s3075_s17 = scalar_lea.hbm %s3770_s4, 2048 }
  0x37   :  { %p3076_p10 = scmp.ne.s32.totalorder %s3770_s4, %s3075_s17  ;;  %p3079_p11 = scmp.lt.u32.totalorder %s3075_s17, %s3770_s4 }
  0x39   :  { %p3081_p12 = pnand %p3079_p11, %p3076_p10 }
  0x3b   :  { %3084 = shalt.err (!%p3081_p12)
}
  0x3c   :  { %s3085_s23 = scalar_lea.vmem %s3202_s27, 2048  ;;  %p3090_p0 = scmp.lt.s32.totalorder %s3202_s27, %s3202_s27 }
  0x3d   :  { %p3086_p13 = scmp.ne.s32.totalorder %s3202_s27, %s3085_s23  ;;  %p3091_p1 = scmp.lt.s32.totalorder %s3085_s23, %s3085_s23 }
  0x3f   :  { %p3092_p2 = por %p3091_p1, %p3090_p0 }
  0x41   :  { %p3093_p3 = pnand %p3092_p2, %p3086_p13 }
  0x43   :  { %3096 = shalt.err (!%p3093_p3)
}
  0x44   :  { %64 = dma.hbm_to_vmem [thread:$0]  %s3770_s4, 2048, %s3202_s27, [#allocation13], %s3131_s1, %s3131_s1, %s3132_s21  }
  0x45   :  { %3119 = dma.done.wait [#allocation7], 1024  }
  0x46   :  { %3120 = vsyncadd [#allocation7], 4294966272 }
  0x47   :  { %3121 = dma.done.wait [#allocation10], 16384  }
  0x48   :  { %3122 = vsyncadd [#allocation10], 4294950912 }
  0x49   :  { %3123 = dma.done.wait [#allocation13], 2048  }
  0x4a   :  { %3124 = vsyncadd [#allocation13], 4294965248  ;;  %v3773_v0 = vmov 0.0   ;;  %v94_v1 = vld [vmem:[#allocation9 + $0x8] sm:$0xff]  ;;  %v93_v3 = vld [vmem:[#allocation9] sm:$0xff] }
  0x4b   :  { %243 = vmatprep.mubr.f32.mxu1 %v3773_v0  ;;  %571 = vmatprep.mubr.f32.mxu0 %v3773_v0  ;;  %v98_v2 = vld [vmem:[#allocation9 + $0x28] sm:$0xff]  ;;  %v97_v5 = vld [vmem:[#allocation9 + $0x20] sm:$0xff] }
  0x4c   :  { %v2199_v4 = vpack.c.bf16 %v98_v2, %v94_v1  ;;  %v438_v6 = vld [vmem:[#allocation11 + $0x8] sm:$0xff]  ;;  %v2201_v8 = vpack.c.bf16 %v97_v5, %v93_v3  ;;  %v437_v10 = vld [vmem:[#allocation11] sm:$0xff] }
  0x4d   :  { %v442_v7 = vld [vmem:[#allocation11 + $0x28] sm:$0xff]  ;;  %v441_v11 = vld [vmem:[#allocation11 + $0x20] sm:$0xff] }
  0x4e   :  { %v3241_v9 = vpack.c.bf16 %v442_v7, %v438_v6  ;;  %v102_v12 = vld [vmem:[#allocation9 + $0x48] sm:$0xff]  ;;  %2200 = vmatprep.subr.bf16.mxu1 %v2199_v4  ;;  %v3243_v13 = vpack.c.bf16 %v441_v11, %v437_v10  ;;  %v101_v15 = vld [vmem:[#allocation9 + $0x40] sm:$0xff] }
  0x4f   :  { %v106_v14 = vld [vmem:[#allocation9 + $0x68] sm:$0xff]  ;;  %v105_v16 = vld [vmem:[#allocation9 + $0x60] sm:$0xff]  ;;  %2202 = vmatpush1.bf16.msra.mxu1 %v2201_v8 }
  0x50   :  { %2264 = vmatprep.subr.bf16.mxu0 %v3241_v9  ;;  %v2203_v17 = vpack.c.bf16 %v106_v14, %v102_v12  ;;  %v2205_v18 = vpack.c.bf16 %v105_v16, %v101_v15  ;;  %v446_v19 = vld [vmem:[#allocation11 + $0x48] sm:$0xff]  ;;  %v445_v21 = vld [vmem:[#allocation11 + $0x40] sm:$0xff] }
  0x51   :  { %v450_v20 = vld [vmem:[#allocation11 + $0x68] sm:$0xff]  ;;  %2266 = vmatpush1.bf16.msra.mxu0 %v3243_v13  ;;  %v449_v23 = vld [vmem:[#allocation11 + $0x60] sm:$0xff] }
  0x52   :  { %v3247_v22 = vpack.c.bf16 %v450_v20, %v446_v19  ;;  %v110_v24 = vld [vmem:[#allocation9 + $0x88] sm:$0xff]  ;;  %2204 = vmatprep.subr.bf16.mxu1 %v2203_v17  ;;  %v3249_v26 = vpack.c.bf16 %v449_v23, %v445_v21  ;;  %v109_v28 = vld [vmem:[#allocation9 + $0x80] sm:$0xff] }
  0x53   :  { %v114_v25 = vld [vmem:[#allocation9 + $0xa8] sm:$0xff]  ;;  %v113_v29 = vld [vmem:[#allocation9 + $0xa0] sm:$0xff]  ;;  %2206 = vmatpush1.bf16.msra.mxu1 %v2205_v18 }
  0x54   :  { %v2207_v27 = vpack.c.bf16 %v114_v25, %v110_v24  ;;  %v454_v30 = vld [vmem:[#allocation11 + $0x88] sm:$0xff]  ;;  %2268 = vmatprep.subr.bf16.mxu0 %v3247_v22  ;;  %v453_v32 = vld [vmem:[#allocation11 + $0x80] sm:$0xff]  ;;  %v2209_v34 = vpack.c.bf16 %v113_v29, %v109_v28 }
  0x55   :  { %v458_v31 = vld [vmem:[#allocation11 + $0xa8] sm:$0xff]  ;;  %v457_v33 = vld [vmem:[#allocation11 + $0xa0] sm:$0xff]  ;;  %2270 = vmatpush1.bf16.msra.mxu0 %v3249_v26 }
  0x56   :  { %v3252_v35 = vpack.c.bf16 %v458_v31, %v454_v30  ;;  %v118_v36 = vld [vmem:[#allocation9 + $0xc8] sm:$0xff]  ;;  %v117_v38 = vld [vmem:[#allocation9 + $0xc0] sm:$0xff]  ;;  %2208 = vmatprep.subr.bf16.mxu1 %v2207_v27  ;;  %v3255_v39 = vpack.c.bf16 %v457_v33, %v453_v32 }
  0x57   :  { %v122_v37 = vld [vmem:[#allocation9 + $0xe8] sm:$0xff]  ;;  %v121_v41 = vld [vmem:[#allocation9 + $0xe0] sm:$0xff]  ;;  %2210 = vmatpush1.bf16.msra.mxu1 %v2209_v34 }
  0x58   :  { %v2211_v40 = vpack.c.bf16 %v122_v37, %v118_v36  ;;  %v462_v42 = vld [vmem:[#allocation11 + $0xc8] sm:$0xff]  ;;  %2272 = vmatprep.subr.bf16.mxu0 %v3252_v35  ;;  %v461_v45 = vld [vmem:[#allocation11 + $0xc0] sm:$0xff]  ;;  %v2213_v49 = vpack.c.bf16 %v121_v41, %v117_v38  ;;  %v96_v37 = vld [vmem:[#allocation9 + $0x18] sm:$0xff] }
  0x59   :  { %v466_v43 = vld [vmem:[#allocation11 + $0xe8] sm:$0xff]  ;;  %v465_v46 = vld [vmem:[#allocation11 + $0xe0] sm:$0xff]  ;;  %2274 = vmatpush1.bf16.msra.mxu0 %v3255_v39  ;;  %v100_v38 = vld [vmem:[#allocation9 + $0x38] sm:$0xff] }
  0x5a   :  { %v3258_v44 = vpack.c.bf16 %v466_v43, %v462_v42  ;;  %v126_v47 = vld [vmem:[#allocation9 + $0x108] sm:$0xff]  ;;  %2212 = vmatprep.subr.bf16.mxu1 %v2211_v40  ;;  %v3261_v52 = vpack.c.bf16 %v465_v46, %v461_v45  ;;  %v125_v54 = vld [vmem:[#allocation9 + $0x100] sm:$0xff]  ;;  %v2231_v42 = vpack.c.bf16 %v100_v38, %v96_v37  ;;  %v95_v43 = vld [vmem:[#allocation9 + $0x10] sm:$0xff] }
  0x5b   :  { %v130_v48 = vld [vmem:[#allocation9 + $0x128] sm:$0xff]  ;;  %v129_v55 = vld [vmem:[#allocation9 + $0x120] sm:$0xff]  ;;  %2214 = vmatpush1.bf16.msra.mxu1 %v2213_v49  ;;  %v99_v45 = vld [vmem:[#allocation9 + $0x30] sm:$0xff] }
  0x5c   :  { %v470_v50 = vld [vmem:[#allocation11 + $0x108] sm:$0xff]  ;;  %v2215_v53 = vpack.c.bf16 %v130_v48, %v126_v47  ;;  %v469_v56 = vld [vmem:[#allocation11 + $0x100] sm:$0xff]  ;;  %2276 = vmatprep.subr.bf16.mxu0 %v3258_v44  ;;  %v2217_v63 = vpack.c.bf16 %v129_v55, %v125_v54  ;;  %v104_v46 = vld [vmem:[#allocation9 + $0x58] sm:$0xff]  ;;  %v2233_v49 = vpack.c.bf16 %v99_v45, %v95_v43 }
  0x5d   :  { %v474_v51 = vld [vmem:[#allocation11 + $0x128] sm:$0xff]  ;;  %v473_v58 = vld [vmem:[#allocation11 + $0x120] sm:$0xff]  ;;  %2278 = vmatpush1.bf16.msra.mxu0 %v3261_v52  ;;  %v108_v47 = vld [vmem:[#allocation9 + $0x78] sm:$0xff] }
  0x5e   :  { %v3264_v57 = vpack.c.bf16 %v474_v51, %v470_v50  ;;  %v134_v59 = vld [vmem:[#allocation9 + $0x148] sm:$0xff]  ;;  %2216 = vmatprep.subr.bf16.mxu1 %v2215_v53  ;;  %v3267_v1 = vpack.c.bf16 %v473_v58, %v469_v56  ;;  %v133_v3 = vld [vmem:[#allocation9 + $0x140] sm:$0xff]  ;;  %v2235_v50 = vpack.c.bf16 %v108_v47, %v104_v46  ;;  %v103_v51 = vld [vmem:[#allocation9 + $0x50] sm:$0xff] }
  0x5f   :  { %v138_v60 = vld [vmem:[#allocation9 + $0x168] sm:$0xff]  ;;  %v137_v4 = vld [vmem:[#allocation9 + $0x160] sm:$0xff]  ;;  %2218 = vmatpush1.bf16.msra.mxu1 %v2217_v63  ;;  %v107_v53 = vld [vmem:[#allocation9 + $0x70] sm:$0xff] }
  0x60   :  { %v478_v61 = vld [vmem:[#allocation11 + $0x148] sm:$0xff]  ;;  %v2219_v2 = vpack.c.bf16 %v138_v60, %v134_v59  ;;  %v477_v5 = vld [vmem:[#allocation11 + $0x140] sm:$0xff]  ;;  %2280 = vmatprep.subr.bf16.mxu0 %v3264_v57  ;;  %v2221_v14 = vpack.c.bf16 %v137_v4, %v133_v3  ;;  %v112_v54 = vld [vmem:[#allocation9 + $0x98] sm:$0xff]  ;;  %v2237_v58 = vpack.c.bf16 %v107_v53, %v103_v51 }
  0x61   :  { %v482_v62 = vld [vmem:[#allocation11 + $0x168] sm:$0xff]  ;;  %v481_v7 = vld [vmem:[#allocation11 + $0x160] sm:$0xff]  ;;  %2282 = vmatpush1.bf16.msra.mxu0 %v3267_v1  ;;  %v116_v55 = vld [vmem:[#allocation9 + $0xb8] sm:$0xff] }
  0x62   :  { %v3270_v6 = vpack.c.bf16 %v482_v62, %v478_v61  ;;  %v142_v8 = vld [vmem:[#allocation9 + $0x188] sm:$0xff]  ;;  %2220 = vmatprep.subr.bf16.mxu1 %v2219_v2  ;;  %v3273_v15 = vpack.c.bf16 %v481_v7, %v477_v5  ;;  %v141_v17 = vld [vmem:[#allocation9 + $0x180] sm:$0xff]  ;;  %v2239_v59 = vpack.c.bf16 %v116_v55, %v112_v54  ;;  %v111_v60 = vld [vmem:[#allocation9 + $0x90] sm:$0xff] }
  0x63   :  { %v146_v10 = vld [vmem:[#allocation9 + $0x1a8] sm:$0xff]  ;;  %v145_v18 = vld [vmem:[#allocation9 + $0x1a0] sm:$0xff]  ;;  %2222 = vmatpush1.bf16.msra.mxu1 %v2221_v14  ;;  %v115_v61 = vld [vmem:[#allocation9 + $0xb0] sm:$0xff] }
  0x64   :  { %v486_v11 = vld [vmem:[#allocation11 + $0x188] sm:$0xff]  ;;  %v2223_v16 = vpack.c.bf16 %v146_v10, %v142_v8  ;;  %v485_v19 = vld [vmem:[#allocation11 + $0x180] sm:$0xff]  ;;  %2284 = vmatprep.subr.bf16.mxu0 %v3270_v6  ;;  %v2225_v28 = vpack.c.bf16 %v145_v18, %v141_v17  ;;  %v120_v62 = vld [vmem:[#allocation9 + $0xd8] sm:$0xff]  ;;  %v2241_v3 = vpack.c.bf16 %v115_v61, %v111_v60 }
  0x65   :  { %v490_v12 = vld [vmem:[#allocation11 + $0x1a8] sm:$0xff]  ;;  %v489_v21 = vld [vmem:[#allocation11 + $0x1a0] sm:$0xff]  ;;  %2286 = vmatpush1.bf16.msra.mxu0 %v3273_v15  ;;  %v124_v63 = vld [vmem:[#allocation9 + $0xf8] sm:$0xff] }
  0x66   :  { %v3276_v20 = vpack.c.bf16 %v490_v12, %v486_v11  ;;  %v150_v23 = vld [vmem:[#allocation9 + $0x1c8] sm:$0xff]  ;;  %2224 = vmatprep.subr.bf16.mxu1 %v2223_v16  ;;  %v3279_v29 = vpack.c.bf16 %v489_v21, %v485_v19  ;;  %v149_v31 = vld [vmem:[#allocation9 + $0x1c0] sm:$0xff]  ;;  %v3302_v2 = vld [vmem:[#allocation6 + $0x10] sm:$0xff]  ;;  %v2243_v4 = vpack.c.bf16 %v124_v63, %v120_v62 }
  0x67   :  { %v154_v24 = vld [vmem:[#allocation9 + $0x1e8] sm:$0xff]  ;;  %v153_v32 = vld [vmem:[#allocation9 + $0x1e0] sm:$0xff]  ;;  %2226 = vmatpush1.bf16.msra.mxu1 %v2225_v28  ;;  %v119_v5 = vld [vmem:[#allocation9 + $0xd0] sm:$0xff] }
  0x68   :  { %v494_v25 = vld [vmem:[#allocation11 + $0x1c8] sm:$0xff]  ;;  %v2227_v30 = vpack.c.bf16 %v154_v24, %v150_v23  ;;  %v493_v33 = vld [vmem:[#allocation11 + $0x1c0] sm:$0xff]  ;;  %2288 = vmatprep.subr.bf16.mxu0 %v3276_v20  ;;  %v2229_v40 = vpack.c.bf16 %v153_v32, %v149_v31  ;;  %v123_v7 = vld [vmem:[#allocation9 + $0xf0] sm:$0xff] }
  0x69   :  { %v498_v27 = vld [vmem:[#allocation11 + $0x1e8] sm:$0xff]  ;;  %v497_v36 = vld [vmem:[#allocation11 + $0x1e0] sm:$0xff]  ;;  %2290 = vmatpush1.bf16.msra.mxu0 %v3279_v29  ;;  %v128_v8 = vld [vmem:[#allocation9 + $0x118] sm:$0xff]  ;;  %v2245_v12 = vpack.c.bf16 %v123_v7, %v119_v5 }
  0x6a   :  { %v3282_v34 = vpack.c.bf16 %v498_v27, %v494_v25  ;;  %2228 = vmatprep.subr.bf16.mxu1 %v2227_v30  ;;  %v3285_v41 = vpack.c.bf16 %v497_v36, %v493_v33  ;;  %v3288_v48 = vld [vmem:[#allocation6] sm:$0xff]  ;;  %v3294_v56 = vld [vmem:[#allocation6 + $0x8] sm:$0xff]  ;;  %v132_v10 = vld [vmem:[#allocation9 + $0x138] sm:$0xff] }
  0x6b   :  { %2230 = vmatpush1.bf16.msra.mxu1 %v2229_v40  ;;  %v3308_v11 = vld [vmem:[#allocation6 + $0x18] sm:$0xff]  ;;  %v2247_v14 = vpack.c.bf16 %v132_v10, %v128_v8  ;;  %v127_v16 = vld [vmem:[#allocation9 + $0x110] sm:$0xff]  ;;  %v3314_v21 = vld [vmem:[#allocation6 + $0x20] sm:$0xff] }
  0x6c   :  { %2292 = vmatprep.subr.bf16.mxu0 %v3282_v34  ;;  %2232 = vmatprep.subr.bf16.mxu1 %v2231_v42  ;;  %v131_v17 = vld [vmem:[#allocation9 + $0x130] sm:$0xff]  ;;  %v136_v18 = vld [vmem:[#allocation9 + $0x158] sm:$0xff]  ;;  %v3320_v31 = vld [vmem:[#allocation6 + $0x28] sm:$0xff] }
  0x6d   :  { %2294 = vmatpush1.bf16.msra.mxu0 %v3285_v41  ;;  %v140_v19 = vld [vmem:[#allocation9 + $0x178] sm:$0xff]  ;;  %v2249_v23 = vpack.c.bf16 %v131_v17, %v127_v16  ;;  %v135_v25 = vld [vmem:[#allocation9 + $0x150] sm:$0xff] }
  0x6e   :  { %2328 = vmatprep.subr.bf16.mxu0 %v3241_v9  ;;  %244 = vmatmul.mubr.f32.vlgmr.msra.gmra.mrb[0].mxu1 %v3288_v48  ;;  %v2251_v24 = vpack.c.bf16 %v140_v19, %v136_v18  ;;  %v139_v27 = vld [vmem:[#allocation9 + $0x170] sm:$0xff]  ;;  %v144_v28 = vld [vmem:[#allocation9 + $0x198] sm:$0xff] }
  0x6f   :  { %2234 = vmatpush1.bf16.msra.mxu1 %v2233_v49  ;;  %249 = vmatprep.mubr.f32.mxu1 %v3773_v0  ;;  %v148_v30 = vld [vmem:[#allocation9 + $0x1b8] sm:$0xff]  ;;  %v2253_v32 = vpack.c.bf16 %v139_v27, %v135_v25  ;;  %v143_v36 = vld [vmem:[#allocation9 + $0x190] sm:$0xff] }
  0x70   :  { %572 = vmatmul.mubr.f32.vlgmr.msra.gmra.mrb[0].mxu0 %v3773_v0  ;;  %2236 = vmatprep.subr.bf16.mxu1 %v2235_v50  ;;  %v2255_v33 = vpack.c.bf16 %v148_v30, %v144_v28  ;;  %v147_v37 = vld [vmem:[#allocation9 + $0x1b0] sm:$0xff]  ;;  %v152_v38 = vld [vmem:[#allocation9 + $0x1d8] sm:$0xff] }
  0x71   :  { %2330 = vmatpush1.bf16.msra.mxu0 %v3243_v13  ;;  %747 = vmatprep.mubr.f32.mxu0 %v3773_v0  ;;  %v156_v40 = vld [vmem:[#allocation9 + $0x1f8] sm:$0xff]  ;;  %v3326_v42 = vld [vmem:[#allocation6 + $0x30] sm:$0xff]  ;;  %v2257_v43 = vpack.c.bf16 %v147_v37, %v143_v36 }
  0x72   :  { %250 = vmatmul.mubr.f32.gmra.mrb[2].mxu1 %v3294_v56  ;;  %2332 = vmatprep.subr.bf16.mxu0 %v3247_v22  ;;  %v2259_v45 = vpack.c.bf16 %v156_v40, %v152_v38  ;;  %v151_v46 = vld [vmem:[#allocation9 + $0x1d0] sm:$0xff]  ;;  %v440_v49 = vld [vmem:[#allocation11 + $0x18] sm:$0xff] }
  0x73   :  { %2238 = vmatpush1.bf16.msra.mxu1 %v2237_v58  ;;  %255 = vmatprep.mubr.f32.mxu1 %v3773_v0  ;;  %v155_v47 = vld [vmem:[#allocation9 + $0x1f0] sm:$0xff]  ;;  %v444_v50 = vld [vmem:[#allocation11 + $0x38] sm:$0xff] }
  0x74   :  { %2240 = vmatprep.subr.bf16.mxu1 %v2239_v59  ;;  %v3332_v51 = vld [vmem:[#allocation6 + $0x38] sm:$0xff]  ;;  %v2261_v53 = vpack.c.bf16 %v155_v47, %v151_v46  ;;  %v3334_v54 = vpack.c.bf16 %v444_v50, %v440_v49  ;;  %v439_v55 = vld [vmem:[#allocation11 + $0x10] sm:$0xff] }
  0x75   :  { %2334 = vmatpush1.bf16.msra.mxu0 %v3249_v26  ;;  %v443_v58 = vld [vmem:[#allocation11 + $0x30] sm:$0xff]  ;;  %v448_v59 = vld [vmem:[#allocation11 + $0x58] sm:$0xff] }
  0x76   :  { %256 = vmatmul.mubr.f32.gmra.mrb[4].mxu1 %v3302_v2  ;;  %2336 = vmatprep.subr.bf16.mxu0 %v3252_v35  ;;  %v452_v60 = vld [vmem:[#allocation11 + $0x78] sm:$0xff]  ;;  %v3340_v61 = vpack.c.bf16 %v443_v58, %v439_v55  ;;  %v447_v63 = vld [vmem:[#allocation11 + $0x50] sm:$0xff] }
  0x77   :  { %2242 = vmatpush1.bf16.msra.mxu1 %v2241_v3  ;;  %261 = vmatprep.mubr.f32.mxu1 %v3773_v0  ;;  %v3343_v62 = vpack.c.bf16 %v452_v60, %v448_v59  ;;  %v451_v3 = vld [vmem:[#allocation11 + $0x70] sm:$0xff]  ;;  %v460_v5 = vld [vmem:[#allocation11 + $0xb8] sm:$0xff]  ;;  %v157_v59 = vld [vmem:[%s3769_s3] sm:$0xf] }
  0x78   :  { %2244 = vmatprep.subr.bf16.mxu1 %v2243_v4  ;;  %v456_v4 = vld [vmem:[#allocation11 + $0x98] sm:$0xff]  ;;  %v3350_v7 = vpack.c.bf16 %v451_v3, %v447_v63  ;;  %v455_v10 = vld [vmem:[#allocation11 + $0x90] sm:$0xff] }
  0x79   :  { %2338 = vmatpush1.bf16.msra.mxu0 %v3255_v39  ;;  %v3353_v8 = vpack.c.bf16 %v460_v5, %v456_v4  ;;  %v468_v16 = vld [vmem:[#allocation11 + $0xf8] sm:$0xff]  ;;  %v463_v18 = vld [vmem:[#allocation11 + $0xd0] sm:$0xff] }
  0x7a   :  { %262 = vmatmul.mubr.f32.gmra.mrb[6].mxu1 %v3308_v11  ;;  %2340 = vmatprep.subr.bf16.mxu0 %v3258_v44  ;;  %v467_v19 = vld [vmem:[#allocation11 + $0xf0] sm:$0xff]  ;;  %v480_v30 = vld [vmem:[#allocation11 + $0x158] sm:$0xff] }
  0x7b   :  { %2246 = vmatpush1.bf16.msra.mxu1 %v2245_v12  ;;  %267 = vmatprep.mubr.f32.mxu1 %v3773_v0  ;;  %v459_v12 = vld [vmem:[#allocation11 + $0xb0] sm:$0xff]  ;;  %v488_v38 = vld [vmem:[#allocation11 + $0x198] sm:$0xff] }
  0x7c   :  { %2248 = vmatprep.subr.bf16.mxu1 %v2247_v14  ;;  %v464_v14 = vld [vmem:[#allocation11 + $0xd8] sm:$0xff]  ;;  %v471_v27 = vld [vmem:[#allocation11 + $0x110] sm:$0xff] }
  0x7d   :  { %2342 = vmatpush1.bf16.msra.mxu0 %v3261_v52  ;;  %v3361_v17 = vpack.c.bf16 %v468_v16, %v464_v14  ;;  %v475_v28 = vld [vmem:[#allocation11 + $0x130] sm:$0xff]  ;;  %v492_v40 = vld [vmem:[#allocation11 + $0x1b8] sm:$0xff] }
  0x7e   :  { %268 = vmatmul.mubr.f32.gmra.mrb[8].mxu1 %v3314_v21  ;;  %2344 = vmatprep.subr.bf16.mxu0 %v3264_v57  ;;  %v479_v36 = vld [vmem:[#allocation11 + $0x150] sm:$0xff]  ;;  %v496_v47 = vld [vmem:[#allocation11 + $0x1d8] sm:$0xff] }
  0x7f   :  { %2250 = vmatpush1.bf16.msra.mxu1 %v2249_v23  ;;  %273 = vmatprep.mubr.f32.mxu1 %v3773_v0  ;;  %v472_v23 = vld [vmem:[#allocation11 + $0x118] sm:$0xff]  ;;  %v483_v37 = vld [vmem:[#allocation11 + $0x170] sm:$0xff] }
  0x80   :  { %2252 = vmatprep.subr.bf16.mxu1 %v2251_v24  ;;  %v476_v24 = vld [vmem:[#allocation11 + $0x138] sm:$0xff]  ;;  %v491_v46 = vld [vmem:[#allocation11 + $0x1b0] sm:$0xff] }
  0x81   :  { %2346 = vmatpush1.bf16.msra.mxu0 %v3267_v1  ;;  %v3369_v25 = vpack.c.bf16 %v476_v24, %v472_v23  ;;  %v500_v49 = vld [vmem:[#allocation11 + $0x1f8] sm:$0xff]  ;;  %v499_v55 = vld [vmem:[#allocation11 + $0x1f0] sm:$0xff] }
  0x82   :  { %274 = vmatmul.mubr.f32.gmra.mrb[10].mxu1 %v3320_v31  ;;  %2348 = vmatprep.subr.bf16.mxu0 %v3270_v6  ;;  %v3393_v50 = vpack.c.bf16 %v500_v49, %v496_v47 }
  0x83   :  { %2254 = vmatpush1.bf16.msra.mxu1 %v2253_v32  ;;  %279 = vmatprep.mubr.f32.mxu1 %v3773_v0  ;;  %v484_v32 = vld [vmem:[#allocation11 + $0x178] sm:$0xff] }
  0x84   :  { %2256 = vmatprep.subr.bf16.mxu1 %v2255_v33  ;;  %v3377_v33 = vpack.c.bf16 %v484_v32, %v480_v30 }
  0x85   :  { %2350 = vmatpush1.bf16.msra.mxu0 %v3273_v15 }
  0x86   :  { %280 = vmatmul.mubr.f32.gmra.mrb[12].mxu1 %v3326_v42  ;;  %2352 = vmatprep.subr.bf16.mxu0 %v3276_v20 }
  0x87   :  { %2258 = vmatpush1.bf16.msra.mxu1 %v2257_v43  ;;  %285 = vmatprep.mubr.f32.mxu1 %v3773_v0  ;;  %v3385_v43 = vpack.c.bf16 %v492_v40, %v488_v38 }
  0x88   :  { %2260 = vmatprep.subr.bf16.mxu1 %v2259_v45  ;;  %v487_v45 = vld [vmem:[#allocation11 + $0x190] sm:$0xff] }
  0x89   :  { %2354 = vmatpush1.bf16.msra.mxu0 %v3279_v29 }
  0x8a   :  { %286 = vmatmul.mubr.f32.gmra.mrb[14].mxu1 %v3332_v51  ;;  %2356 = vmatprep.subr.bf16.mxu0 %v3282_v34 }
  0x8b   :  { %2262 = vmatpush1.bf16.msra.mxu1 %v2261_v53  ;;  %356 = vmatprep.mubr.f32.mxu1 %v3773_v0  ;;  %v495_v53 = vld [vmem:[#allocation11 + $0x1d0] sm:$0xff] }
  0x8c   :  { %2296 = vmatprep.subr.bf16.mxu1 %v3334_v54  ;;  %v3398_v58 = vpack.c.bf16 %v499_v55, %v495_v53 }
  0x8d   :  { %2358 = vmatpush1.bf16.msra.mxu0 %v3285_v41 }
  0x8e   :  { %357 = vmatmul.mubr.f32.vlgmr.msra.gmra.mrb[16].mxu1 %v3288_v48  ;;  %2392 = vmatprep.subr.bf16.mxu0 %v3241_v9  ;;  %v3358_v48 = vpack.c.bf16 %v459_v12, %v455_v10 }
  0x8f   :  { %2298 = vmatpush1.bf16.msra.mxu1 %v3340_v61  ;;  %362 = vmatprep.mubr.f32.mxu1 %v3773_v0 }
  0x90   :  { %2300 = vmatprep.subr.bf16.mxu1 %v3343_v62 }
  0x92   :  { %363 = vmatmul.mubr.f32.gmra.mrb[18].mxu1 %v3294_v56  ;;  %v3366_v56 = vpack.c.bf16 %v467_v19, %v463_v18 }
  0x93   :  { %2302 = vmatpush1.bf16.msra.mxu1 %v3350_v7  ;;  %368 = vmatprep.mubr.f32.mxu1 %v3773_v0 }
  0x94   :  { %2304 = vmatprep.subr.bf16.mxu1 %v3353_v8 }
  0x96   :  { %369 = vmatmul.mubr.f32.gmra.mrb[20].mxu1 %v3302_v2  ;;  %v3374_v2 = vpack.c.bf16 %v475_v28, %v471_v27 }
  0x97   :  { %2306 = vmatpush1.bf16.msra.mxu1 %v3358_v48  ;;  %374 = vmatprep.mubr.f32.mxu1 %v3773_v0 }
  0x98   :  { %2308 = vmatprep.subr.bf16.mxu1 %v3361_v17 }
  0x9a   :  { %375 = vmatmul.mubr.f32.gmra.mrb[22].mxu1 %v3308_v11  ;;  %v3382_v11 = vpack.c.bf16 %v483_v37, %v479_v36 }
  0x9b   :  { %2310 = vmatpush1.bf16.msra.mxu1 %v3366_v56  ;;  %380 = vmatprep.mubr.f32.mxu1 %v3773_v0 }
  0x9c   :  { %2312 = vmatprep.subr.bf16.mxu1 %v3369_v25 }
  0x9e   :  { %381 = vmatmul.mubr.f32.gmra.mrb[24].mxu1 %v3314_v21  ;;  %v3390_v21 = vpack.c.bf16 %v491_v46, %v487_v45 }
  0x9f   :  { %2314 = vmatpush1.bf16.msra.mxu1 %v3374_v2  ;;  %386 = vmatprep.mubr.f32.mxu1 %v3773_v0 }
  0xa0   :  { %2316 = vmatprep.subr.bf16.mxu1 %v3377_v33 }
  0xa2   :  { %387 = vmatmul.mubr.f32.gmra.mrb[26].mxu1 %v3320_v31  ;;  %v159_v31 = vlaneseq }
  0xa3   :  { %2318 = vmatpush1.bf16.msra.mxu1 %v3382_v11  ;;  %392 = vmatprep.mubr.f32.mxu1 %v3773_v0 }
  0xa4   :  { %2320 = vmatprep.subr.bf16.mxu1 %v3385_v43 }
  0xa6   :  { %393 = vmatmul.mubr.f32.gmra.mrb[28].mxu1 %v3326_v42  ;;  %v160_v42 = vshrl.u32 %v159_v31, 7 }
  0xa7   :  { %2322 = vmatpush1.bf16.msra.mxu1 %v3390_v21  ;;  %398 = vmatprep.mubr.f32.mxu1 %v3773_v0 }
  0xa8   :  { %2324 = vmatprep.subr.bf16.mxu1 %v3393_v50  ;;  %v165_v60 = vsub.s32 1, %v160_v42 }
  0xaa   :  { %399 = vmatmul.mubr.f32.gmra.mrb[30].mxu1 %v3332_v51  ;;  %v161_v51 = vsub.s32 0, %v160_v42  ;;  %v166_v3 = vrot.slane %v157_v59, %v165_v60 }
  0xab   :  { %2326 = vmatpush1.bf16.msra.mxu1 %v3398_v58  ;;  %642 = vmatprep.mubr.f32.mxu1 %v3773_v0 }
  0xac   :  { %2360 = vmatprep.subr.bf16.mxu1 %v3334_v54  ;;  %v162_v63 = vrot.slane %v157_v59, %v161_v51 }
  0xae   :  { %643 = vmatmul.mubr.f32.vlgmr.msra.gmra.mrb[16].mxu1 %v3773_v0 }
  0xaf   :  { %2362 = vmatpush1.bf16.msra.mxu1 %v3340_v61  ;;  %818 = vmatprep.mubr.f32.mxu1 %v3773_v0 }
  0xb0   :  { %2364 = vmatprep.subr.bf16.mxu1 %v3343_v62 }
  0xb3   :  { %2366 = vmatpush1.bf16.msra.mxu1 %v3350_v7 }
  0xb4   :  { %2368 = vmatprep.subr.bf16.mxu1 %v3353_v8 }
  0xb7   :  { %2370 = vmatpush1.bf16.msra.mxu1 %v3358_v48 }
  0xb8   :  { %2372 = vmatprep.subr.bf16.mxu1 %v3361_v17 }
  0xbb   :  { %2374 = vmatpush1.bf16.msra.mxu1 %v3366_v56 }
  0xbc   :  { %2376 = vmatprep.subr.bf16.mxu1 %v3369_v25 }
  0xbf   :  { %2378 = vmatpush1.bf16.msra.mxu1 %v3374_v2 }
  0xc0   :  { %2380 = vmatprep.subr.bf16.mxu1 %v3377_v33 }
  0xc3   :  { %2382 = vmatpush1.bf16.msra.mxu1 %v3382_v11 }
  0xc4   :  { %2384 = vmatprep.subr.bf16.mxu1 %v3385_v43 }
  0xc7   :  { %2386 = vmatpush1.bf16.msra.mxu1 %v3390_v21 }
  0xc8   :  { %2388 = vmatprep.subr.bf16.mxu1 %v3393_v50 }
  0xcb   :  { %2390 = vmatpush1.bf16.msra.mxu1 %v3398_v58 }
  0xcc   :  { %2424 = vmatprep.subr.bf16.mxu1 %v3334_v54 }
 0x141   :  { %v245_v4 = vpop.f32.mrb[0].mxu1 }
 0x142   :  { %v246_v5 = vadd.f32 %v245_v4, %v162_v63  ;;  %v247_v10 = vpop.f32.mrb[1].mxu1 }
 0x143   :  { %v573_v12 = vpop.f32.mrb[0].mxu0  ;;  %v248_v14 = vadd.f32 %v247_v10, %v166_v3 }
 0x144   :  { %v575_v16 = vpop.f32.mrb[1].mxu0  ;;  %v649_v18 = vadd.f32 %v573_v12, %v246_v5 }
 0x145   :  { %v650_v19 = vadd.f32 %v575_v16, %v248_v14  ;;  %v251_v23 = vpop.f32.mrb[2].mxu1 }
 0x146   :  { %v3426_v24 = vadd.f32 %v251_v23, %v162_v63  ;;  %v253_v27 = vpop.f32.mrb[3].mxu1 }
 0x147   :  { %v3428_v28 = vadd.f32 %v253_v27, %v166_v3 }
 0x149   :  { %v257_v30 = vpop.f32.mrb[4].mxu1 }
 0x14a   :  { %v3430_v32 = vadd.f32 %v257_v30, %v162_v63  ;;  %v259_v36 = vpop.f32.mrb[5].mxu1 }
 0x14b   :  { %v3432_v37 = vadd.f32 %v259_v36, %v166_v3  ;;  %v2107_v36 = vmul.f32 -1.442695, %v650_v19 }
 0x14d   :  { %v263_v38 = vpop.f32.mrb[6].mxu1  ;;  %2881 = vpow2.f32 %v2107_v36 }
 0x14e   :  { %v3434_v40 = vadd.f32 %v263_v38, %v162_v63  ;;  %v265_v45 = vpop.f32.mrb[7].mxu1  ;;  %v2106_v38 = vmul.f32 -1.442695, %v649_v18 }
 0x14f   :  { %v3436_v46 = vadd.f32 %v265_v45, %v166_v3  ;;  %v169_v45 = vsub.s32 2, %v160_v42 }
 0x150   :  { %2883 = vpow2.f32 %v2106_v38 }
 0x151   :  { %v269_v47 = vpop.f32.mrb[8].mxu1 }
 0x152   :  { %v3438_v49 = vadd.f32 %v269_v47, %v162_v63  ;;  %v271_v53 = vpop.f32.mrb[9].mxu1 }
 0x153   :  { %v3440_v55 = vadd.f32 %v271_v53, %v166_v3  ;;  %v173_v53 = vsub.s32 3, %v160_v42 }
 0x155   :  { %v275_v31 = vpop.f32.mrb[10].mxu1 }
 0x156   :  { %v3442_v51 = vadd.f32 %v275_v31, %v162_v63  ;;  %v277_v60 = vpop.f32.mrb[11].mxu1 }
 0x157   :  { %v3444_v4 = vadd.f32 %v277_v60, %v166_v3  ;;  %v2882_v47 = vpop.eup %2881 }
 0x158   :  { %v662_v60 = vadd.f32 1.0, %v2882_v47 }
 0x159   :  { %v281_v5 = vpop.f32.mrb[12].mxu1 }
 0x15a   :  { %v3446_v10 = vadd.f32 %v281_v5, %v162_v63  ;;  %v283_v12 = vpop.f32.mrb[13].mxu1  ;;  %v2884_v31 = vpop.eup %2883  ;;  %v3454_v5 = vrot.slane %v157_v59, %v169_v45  ;;  %2885 = vrcp.f32 %v662_v60 }
 0x15b   :  { %v3448_v14 = vadd.f32 %v283_v12, %v166_v3  ;;  %v656_v0 = vadd.f32 1.0, %v2884_v31  ;;  %v3456_v12 = vrot.slane %v157_v59, %v173_v53  ;;  %v3777_v31 = vmov 0.0  }
 0x15d   :  { %3775 = vst [vmem:[#allocation19_spill] sm:$0xff] %v3448_v14  ;;  %v287_v16 = vpop.f32.mrb[14].mxu1  ;;  %2887 = vrcp.f32 %v656_v0 }
 0x15e   :  { %v3450_v23 = vadd.f32 %v287_v16, %v162_v63  ;;  %v289_v27 = vpop.f32.mrb[15].mxu1 }
 0x15f   :  { %v3452_v30 = vadd.f32 %v289_v27, %v166_v3 }
 0x161   :  { %3776 = vst [vmem:[#allocation20_spill] sm:$0xff] %v3452_v30 }
 0x164   :  { %v2886_v16 = vpop.eup %2885 }
 0x165   :  { %v672_v36 = vmul.f32 0.0, %v2886_v16 }
 0x167   :  { %v2888_v42 = vpop.eup %2887 }
 0x181   :  { %v644_v14 = vpop.f32.mrb[16].mxu1 }
 0x182   :  { %v2839_v63 = vadd.f32 %v644_v14, %v3454_v5  ;;  %v646_v3 = vpop.f32.mrb[17].mxu1 }
 0x183   :  { %v2840_v18 = vadd.f32 %v646_v3, %v3456_v12 }
 0x184   :  { %2889 = vtanh.f32 %v2839_v63 }
 0x185   :  { %v2108_v19 = vmul.f32 -1.442695, %v2840_v18 }
 0x187   :  { %2891 = vpow2.f32 %v2108_v19 }
 0x18e   :  { %v2890_v27 = vpop.eup %2889 }
 0x18f   :  { %v673_v38 = vmul.f32 %v2890_v27, %v2888_v42 }
 0x191   :  { %v2892_v45 = vpop.eup %2891  ;;  %v3460_v47 = vadd.f32 %v673_v38, %v672_v36 }
 0x192   :  { %v669_v59 = vadd.f32 1.0, %v2892_v45 }
 0x193   :  { %2893 = vtanh.f32 %v3460_v47 }
 0x194   :  { %2895 = vrcp.f32 %v669_v59 }
 0x19d   :  { %v2894_v14 = vpop.eup %2893 }
 0x19e   :  { %v2896_v53 = vpop.eup %2895 }
 0x19f   :  { %v3463_v0 = vmul.f32 %v2896_v53, %v2894_v14 }
 0x1a1   :  { %748 = vmatmul.mubr.f32.vlgmr.msra.gmra.mrb[2].mxu0 %v3463_v0  ;;  %819 = vmatmul.mubr.f32.vlgmr.msra.gmra.mrb[18].mxu1 %v3463_v0 }
 0x1a2   :  { %2394 = vmatpush1.bf16.msra.mxu0 %v3243_v13  ;;  %2426 = vmatpush1.bf16.msra.mxu1 %v3340_v61 }
 0x1a3   :  { %2396 = vmatprep.subr.bf16.mxu0 %v3247_v22  ;;  %2428 = vmatprep.subr.bf16.mxu1 %v3343_v62 }
 0x1a4   :  { %924 = vmatprep.mubr.f32.mxu0 %v3777_v31  ;;  %995 = vmatprep.mubr.f32.mxu1 %v3777_v31 }
 0x1a6   :  { %2398 = vmatpush1.bf16.msra.mxu0 %v3249_v26  ;;  %2430 = vmatpush1.bf16.msra.mxu1 %v3350_v7 }
 0x1a7   :  { %2400 = vmatprep.subr.bf16.mxu0 %v3252_v35  ;;  %2432 = vmatprep.subr.bf16.mxu1 %v3353_v8 }
 0x1aa   :  { %2402 = vmatpush1.bf16.msra.mxu0 %v3255_v39  ;;  %2434 = vmatpush1.bf16.msra.mxu1 %v3358_v48 }
 0x1ab   :  { %2404 = vmatprep.subr.bf16.mxu0 %v3258_v44  ;;  %2436 = vmatprep.subr.bf16.mxu1 %v3361_v17 }
 0x1ae   :  { %2406 = vmatpush1.bf16.msra.mxu0 %v3261_v52  ;;  %2438 = vmatpush1.bf16.msra.mxu1 %v3366_v56 }
 0x1af   :  { %2408 = vmatprep.subr.bf16.mxu0 %v3264_v57  ;;  %2440 = vmatprep.subr.bf16.mxu1 %v3369_v25 }
 0x1b2   :  { %2410 = vmatpush1.bf16.msra.mxu0 %v3267_v1  ;;  %2442 = vmatpush1.bf16.msra.mxu1 %v3374_v2 }
 0x1b3   :  { %2412 = vmatprep.subr.bf16.mxu0 %v3270_v6  ;;  %2444 = vmatprep.subr.bf16.mxu1 %v3377_v33 }
 0x1b6   :  { %2414 = vmatpush1.bf16.msra.mxu0 %v3273_v15  ;;  %2446 = vmatpush1.bf16.msra.mxu1 %v3382_v11 }
 0x1b7   :  { %2416 = vmatprep.subr.bf16.mxu0 %v3276_v20  ;;  %2448 = vmatprep.subr.bf16.mxu1 %v3385_v43 }
 0x1ba   :  { %2418 = vmatpush1.bf16.msra.mxu0 %v3279_v29  ;;  %2450 = vmatpush1.bf16.msra.mxu1 %v3390_v21 }
 0x1bb   :  { %2420 = vmatprep.subr.bf16.mxu0 %v3282_v34  ;;  %2452 = vmatprep.subr.bf16.mxu1 %v3393_v50 }
 0x1be   :  { %2422 = vmatpush1.bf16.msra.mxu0 %v3285_v41  ;;  %2454 = vmatpush1.bf16.msra.mxu1 %v3398_v58 }
 0x1bf   :  { %2456 = vmatprep.subr.bf16.mxu0 %v3241_v9  ;;  %2488 = vmatprep.subr.bf16.mxu1 %v3334_v54 }
 0x274   :  { %v749_v60 = vpop.f32.mrb[2].mxu0  ;;  %v820_v63 = vpop.f32.mrb[18].mxu1 }
 0x275   :  { %v825_v3 = vadd.f32 %v749_v60, %v3426_v24  ;;  %v751_v18 = vpop.f32.mrb[3].mxu0  ;;  %v822_v19 = vpop.f32.mrb[19].mxu1  ;;  %v2841_v45 = vadd.f32 %v820_v63, %v3454_v5 }
 0x276   :  { %v826_v16 = vadd.f32 %v751_v18, %v3428_v28  ;;  %v2842_v36 = vadd.f32 %v822_v19, %v3456_v12 }
 0x277   :  { %v2109_v42 = vmul.f32 -1.442695, %v825_v3 }
 0x278   :  { %v2110_v27 = vmul.f32 -1.442695, %v826_v16  ;;  %v2111_v38 = vmul.f32 -1.442695, %v2842_v36 }
 0x279   :  { %2897 = vpow2.f32 %v2109_v42 }
 0x27a   :  { %2899 = vpow2.f32 %v2110_v27 }
 0x27b   :  { %2901 = vpow2.f32 %v2111_v38 }
 0x27c   :  { %2903 = vtanh.f32 %v2841_v45 }
 0x283   :  { %v2898_v59 = vpop.eup %2897 }
 0x284   :  { %v2900_v14 = vpop.eup %2899  ;;  %v832_v53 = vadd.f32 1.0, %v2898_v59 }
 0x285   :  { %v838_v30 = vadd.f32 1.0, %v2900_v14  ;;  %v2902_v24 = vpop.eup %2901 }
 0x286   :  { %2905 = vrcp.f32 %v832_v53  ;;  %v2904_v60 = vpop.eup %2903  ;;  %v845_v16 = vadd.f32 1.0, %v2902_v24 }
 0x287   :  { %2907 = vrcp.f32 %v838_v30 }
 0x288   :  { %2909 = vrcp.f32 %v845_v16 }
 0x290   :  { %v2906_v28 = vpop.eup %2905 }
 0x291   :  { %v2908_v3 = vpop.eup %2907  ;;  %v849_v18 = vmul.f32 %v2906_v28, %v2904_v60 }
 0x292   :  { %v848_v42 = vmul.f32 %v2908_v3, %v3460_v47  ;;  %v2910_v63 = vpop.eup %2909 }
 0x294   :  { %v3506_v19 = vadd.f32 %v849_v18, %v848_v42 }
 0x296   :  { %2911 = vtanh.f32 %v3506_v19 }
 0x2a0   :  { %v2912_v27 = vpop.eup %2911 }
 0x2a1   :  { %v3509_v36 = vmul.f32 %v2912_v27, %v2910_v63 }
 0x2a3   :  { %925 = vmatmul.mubr.f32.vlgmr.msra.gmra.mrb[4].mxu0 %v3509_v36  ;;  %996 = vmatmul.mubr.f32.vlgmr.msra.gmra.mrb[20].mxu1 %v3509_v36 }
 0x2a4   :  { %2458 = vmatpush1.bf16.msra.mxu0 %v3243_v13  ;;  %2490 = vmatpush1.bf16.msra.mxu1 %v3340_v61 }
 0x2a5   :  { %2460 = vmatprep.subr.bf16.mxu0 %v3247_v22  ;;  %2492 = vmatprep.subr.bf16.mxu1 %v3343_v62 }
 0x2a6   :  { %1101 = vmatprep.mubr.f32.mxu0 %v3777_v31  ;;  %1172 = vmatprep.mubr.f32.mxu1 %v3777_v31 }
 0x2a8   :  { %2462 = vmatpush1.bf16.msra.mxu0 %v3249_v26  ;;  %2494 = vmatpush1.bf16.msra.mxu1 %v3350_v7 }
 0x2a9   :  { %2464 = vmatprep.subr.bf16.mxu0 %v3252_v35  ;;  %2496 = vmatprep.subr.bf16.mxu1 %v3353_v8 }
 0x2ac   :  { %2466 = vmatpush1.bf16.msra.mxu0 %v3255_v39  ;;  %2498 = vmatpush1.bf16.msra.mxu1 %v3358_v48 }
 0x2ad   :  { %2468 = vmatprep.subr.bf16.mxu0 %v3258_v44  ;;  %2500 = vmatprep.subr.bf16.mxu1 %v3361_v17 }
 0x2b0   :  { %2470 = vmatpush1.bf16.msra.mxu0 %v3261_v52  ;;  %2502 = vmatpush1.bf16.msra.mxu1 %v3366_v56 }
 0x2b1   :  { %2472 = vmatprep.subr.bf16.mxu0 %v3264_v57  ;;  %2504 = vmatprep.subr.bf16.mxu1 %v3369_v25 }
 0x2b4   :  { %2474 = vmatpush1.bf16.msra.mxu0 %v3267_v1  ;;  %2506 = vmatpush1.bf16.msra.mxu1 %v3374_v2 }
 0x2b5   :  { %2476 = vmatprep.subr.bf16.mxu0 %v3270_v6  ;;  %2508 = vmatprep.subr.bf16.mxu1 %v3377_v33 }
 0x2b8   :  { %2478 = vmatpush1.bf16.msra.mxu0 %v3273_v15  ;;  %2510 = vmatpush1.bf16.msra.mxu1 %v3382_v11 }
 0x2b9   :  { %2480 = vmatprep.subr.bf16.mxu0 %v3276_v20  ;;  %2512 = vmatprep.subr.bf16.mxu1 %v3385_v43 }
 0x2bc   :  { %2482 = vmatpush1.bf16.msra.mxu0 %v3279_v29  ;;  %2514 = vmatpush1.bf16.msra.mxu1 %v3390_v21 }
 0x2bd   :  { %2484 = vmatprep.subr.bf16.mxu0 %v3282_v34  ;;  %2516 = vmatprep.subr.bf16.mxu1 %v3393_v50 }
 0x2c0   :  { %2486 = vmatpush1.bf16.msra.mxu0 %v3285_v41  ;;  %2518 = vmatpush1.bf16.msra.mxu1 %v3398_v58 }
 0x2c1   :  { %2520 = vmatprep.subr.bf16.mxu0 %v3241_v9  ;;  %2552 = vmatprep.subr.bf16.mxu1 %v3334_v54 }
 0x376   :  { %v926_v30 = vpop.f32.mrb[4].mxu0  ;;  %v997_v47 = vpop.f32.mrb[20].mxu1 }
 0x377   :  { %v1002_v38 = vadd.f32 %v926_v30, %v3430_v32  ;;  %v928_v45 = vpop.f32.mrb[5].mxu0  ;;  %v999_v59 = vpop.f32.mrb[21].mxu1  ;;  %v2843_v3 = vadd.f32 %v997_v47, %v3454_v5 }
 0x378   :  { %v1003_v14 = vadd.f32 %v928_v45, %v3432_v37  ;;  %v2844_v60 = vadd.f32 %v999_v59, %v3456_v12 }
 0x379   :  { %v2112_v53 = vmul.f32 -1.442695, %v1002_v38 }
 0x37a   :  { %v2113_v24 = vmul.f32 -1.442695, %v1003_v14  ;;  %v2114_v28 = vmul.f32 -1.442695, %v2844_v60 }
 0x37b   :  { %2913 = vpow2.f32 %v2112_v53 }
 0x37c   :  { %2915 = vpow2.f32 %v2113_v24 }
 0x37d   :  { %2917 = vpow2.f32 %v2114_v28 }
 0x37e   :  { %2919 = vtanh.f32 %v2843_v3 }
 0x385   :  { %v2914_v18 = vpop.eup %2913 }
 0x386   :  { %v2916_v16 = vpop.eup %2915  ;;  %v1009_v42 = vadd.f32 1.0, %v2914_v18 }
 0x387   :  { %v1015_v63 = vadd.f32 1.0, %v2916_v16  ;;  %v2918_v32 = vpop.eup %2917 }
 0x388   :  { %2921 = vrcp.f32 %v1009_v42  ;;  %v2920_v27 = vpop.eup %2919  ;;  %v1022_v45 = vadd.f32 1.0, %v2918_v32 }
 0x389   :  { %2923 = vrcp.f32 %v1015_v63 }
 0x38a   :  { %2925 = vrcp.f32 %v1022_v45 }
 0x392   :  { %v2922_v37 = vpop.eup %2921 }
 0x393   :  { %v2924_v30 = vpop.eup %2923  ;;  %v1026_v38 = vmul.f32 %v2922_v37, %v2920_v27 }
 0x394   :  { %v1025_v14 = vmul.f32 %v2924_v30, %v3506_v19  ;;  %v2926_v47 = vpop.eup %2925 }
 0x396   :  { %v3552_v59 = vadd.f32 %v1026_v38, %v1025_v14 }
 0x398   :  { %2927 = vtanh.f32 %v3552_v59 }
 0x3a2   :  { %v2928_v53 = vpop.eup %2927 }
 0x3a3   :  { %v3555_v24 = vmul.f32 %v2928_v53, %v2926_v47 }
 0x3a5   :  { %1102 = vmatmul.mubr.f32.vlgmr.msra.gmra.mrb[6].mxu0 %v3555_v24  ;;  %1173 = vmatmul.mubr.f32.vlgmr.msra.gmra.mrb[22].mxu1 %v3555_v24 }
 0x3a6   :  { %2522 = vmatpush1.bf16.msra.mxu0 %v3243_v13  ;;  %2554 = vmatpush1.bf16.msra.mxu1 %v3340_v61 }
 0x3a7   :  { %2524 = vmatprep.subr.bf16.mxu0 %v3247_v22  ;;  %2556 = vmatprep.subr.bf16.mxu1 %v3343_v62 }
 0x3a8   :  { %1278 = vmatprep.mubr.f32.mxu0 %v3777_v31  ;;  %1349 = vmatprep.mubr.f32.mxu1 %v3777_v31 }
 0x3aa   :  { %2526 = vmatpush1.bf16.msra.mxu0 %v3249_v26  ;;  %2558 = vmatpush1.bf16.msra.mxu1 %v3350_v7 }
 0x3ab   :  { %2528 = vmatprep.subr.bf16.mxu0 %v3252_v35  ;;  %2560 = vmatprep.subr.bf16.mxu1 %v3353_v8 }
 0x3ae   :  { %2530 = vmatpush1.bf16.msra.mxu0 %v3255_v39  ;;  %2562 = vmatpush1.bf16.msra.mxu1 %v3358_v48 }
 0x3af   :  { %2532 = vmatprep.subr.bf16.mxu0 %v3258_v44  ;;  %2564 = vmatprep.subr.bf16.mxu1 %v3361_v17 }
 0x3b2   :  { %2534 = vmatpush1.bf16.msra.mxu0 %v3261_v52  ;;  %2566 = vmatpush1.bf16.msra.mxu1 %v3366_v56 }
 0x3b3   :  { %2536 = vmatprep.subr.bf16.mxu0 %v3264_v57  ;;  %2568 = vmatprep.subr.bf16.mxu1 %v3369_v25 }
 0x3b6   :  { %2538 = vmatpush1.bf16.msra.mxu0 %v3267_v1  ;;  %2570 = vmatpush1.bf16.msra.mxu1 %v3374_v2 }
 0x3b7   :  { %2540 = vmatprep.subr.bf16.mxu0 %v3270_v6  ;;  %2572 = vmatprep.subr.bf16.mxu1 %v3377_v33 }
 0x3ba   :  { %2542 = vmatpush1.bf16.msra.mxu0 %v3273_v15  ;;  %2574 = vmatpush1.bf16.msra.mxu1 %v3382_v11 }
 0x3bb   :  { %2544 = vmatprep.subr.bf16.mxu0 %v3276_v20  ;;  %2576 = vmatprep.subr.bf16.mxu1 %v3385_v43 }
 0x3be   :  { %2546 = vmatpush1.bf16.msra.mxu0 %v3279_v29  ;;  %2578 = vmatpush1.bf16.msra.mxu1 %v3390_v21 }
 0x3bf   :  { %2548 = vmatprep.subr.bf16.mxu0 %v3282_v34  ;;  %2580 = vmatprep.subr.bf16.mxu1 %v3393_v50 }
 0x3c2   :  { %2550 = vmatpush1.bf16.msra.mxu0 %v3285_v41  ;;  %2582 = vmatpush1.bf16.msra.mxu1 %v3398_v58 }
 0x3c3   :  { %2584 = vmatprep.subr.bf16.mxu0 %v3241_v9  ;;  %2616 = vmatprep.subr.bf16.mxu1 %v3334_v54 }
 0x478   :  { %v1103_v19 = vpop.f32.mrb[6].mxu0  ;;  %v1174_v60 = vpop.f32.mrb[22].mxu1 }
 0x479   :  { %v1179_v28 = vadd.f32 %v1103_v19, %v3434_v40  ;;  %v1105_v3 = vpop.f32.mrb[7].mxu0  ;;  %v1176_v18 = vpop.f32.mrb[23].mxu1  ;;  %v2845_v37 = vadd.f32 %v1174_v60, %v3454_v5 }
 0x47a   :  { %v1180_v16 = vadd.f32 %v1105_v3, %v3436_v46  ;;  %v2846_v32 = vadd.f32 %v1176_v18, %v3456_v12 }
 0x47b   :  { %v2115_v42 = vmul.f32 -1.442695, %v1179_v28 }
 0x47c   :  { %v2116_v63 = vmul.f32 -1.442695, %v1180_v16  ;;  %v2117_v27 = vmul.f32 -1.442695, %v2846_v32 }
 0x47d   :  { %2929 = vpow2.f32 %v2115_v42 }
 0x47e   :  { %2931 = vpow2.f32 %v2116_v63 }
 0x47f   :  { %2933 = vpow2.f32 %v2117_v27 }
 0x480   :  { %2935 = vtanh.f32 %v2845_v37 }
 0x487   :  { %v2930_v30 = vpop.eup %2929 }
 0x488   :  { %v2932_v38 = vpop.eup %2931  ;;  %v1186_v45 = vadd.f32 1.0, %v2930_v30 }
 0x489   :  { %v1192_v14 = vadd.f32 1.0, %v2932_v38  ;;  %v2934_v40 = vpop.eup %2933 }
 0x48a   :  { %2937 = vrcp.f32 %v1186_v45  ;;  %v2936_v47 = vpop.eup %2935  ;;  %v1199_v28 = vadd.f32 1.0, %v2934_v40 }
 0x48b   :  { %2939 = vrcp.f32 %v1192_v14 }
 0x48c   :  { %2941 = vrcp.f32 %v1199_v28 }
 0x494   :  { %v2938_v46 = vpop.eup %2937 }
 0x495   :  { %v2940_v53 = vpop.eup %2939  ;;  %v1203_v19 = vmul.f32 %v2938_v46, %v2936_v47 }
 0x496   :  { %v1202_v3 = vmul.f32 %v2940_v53, %v3552_v59  ;;  %v2942_v60 = vpop.eup %2941 }
 0x498   :  { %v3598_v18 = vadd.f32 %v1203_v19, %v1202_v3 }
 0x49a   :  { %2943 = vtanh.f32 %v3598_v18 }
 0x4a4   :  { %v2944_v16 = vpop.eup %2943 }
 0x4a5   :  { %v3601_v42 = vmul.f32 %v2944_v16, %v2942_v60 }
 0x4a7   :  { %1279 = vmatmul.mubr.f32.vlgmr.msra.gmra.mrb[8].mxu0 %v3601_v42  ;;  %1350 = vmatmul.mubr.f32.vlgmr.msra.gmra.mrb[24].mxu1 %v3601_v42 }
 0x4a8   :  { %2586 = vmatpush1.bf16.msra.mxu0 %v3243_v13  ;;  %2618 = vmatpush1.bf16.msra.mxu1 %v3340_v61 }
 0x4a9   :  { %2588 = vmatprep.subr.bf16.mxu0 %v3247_v22  ;;  %2620 = vmatprep.subr.bf16.mxu1 %v3343_v62 }
 0x4aa   :  { %1455 = vmatprep.mubr.f32.mxu0 %v3777_v31  ;;  %1526 = vmatprep.mubr.f32.mxu1 %v3777_v31 }
 0x4ac   :  { %2590 = vmatpush1.bf16.msra.mxu0 %v3249_v26  ;;  %2622 = vmatpush1.bf16.msra.mxu1 %v3350_v7 }
 0x4ad   :  { %2592 = vmatprep.subr.bf16.mxu0 %v3252_v35  ;;  %2624 = vmatprep.subr.bf16.mxu1 %v3353_v8 }
 0x4b0   :  { %2594 = vmatpush1.bf16.msra.mxu0 %v3255_v39  ;;  %2626 = vmatpush1.bf16.msra.mxu1 %v3358_v48 }
 0x4b1   :  { %2596 = vmatprep.subr.bf16.mxu0 %v3258_v44  ;;  %2628 = vmatprep.subr.bf16.mxu1 %v3361_v17 }
 0x4b4   :  { %2598 = vmatpush1.bf16.msra.mxu0 %v3261_v52  ;;  %2630 = vmatpush1.bf16.msra.mxu1 %v3366_v56 }
 0x4b5   :  { %2600 = vmatprep.subr.bf16.mxu0 %v3264_v57  ;;  %2632 = vmatprep.subr.bf16.mxu1 %v3369_v25 }
 0x4b8   :  { %2602 = vmatpush1.bf16.msra.mxu0 %v3267_v1  ;;  %2634 = vmatpush1.bf16.msra.mxu1 %v3374_v2 }
 0x4b9   :  { %2604 = vmatprep.subr.bf16.mxu0 %v3270_v6  ;;  %2636 = vmatprep.subr.bf16.mxu1 %v3377_v33 }
 0x4bc   :  { %2606 = vmatpush1.bf16.msra.mxu0 %v3273_v15  ;;  %2638 = vmatpush1.bf16.msra.mxu1 %v3382_v11 }
 0x4bd   :  { %2608 = vmatprep.subr.bf16.mxu0 %v3276_v20  ;;  %2640 = vmatprep.subr.bf16.mxu1 %v3385_v43 }
 0x4c0   :  { %2610 = vmatpush1.bf16.msra.mxu0 %v3279_v29  ;;  %2642 = vmatpush1.bf16.msra.mxu1 %v3390_v21 }
 0x4c1   :  { %2612 = vmatprep.subr.bf16.mxu0 %v3282_v34  ;;  %2644 = vmatprep.subr.bf16.mxu1 %v3393_v50 }
 0x4c4   :  { %2614 = vmatpush1.bf16.msra.mxu0 %v3285_v41  ;;  %2646 = vmatpush1.bf16.msra.mxu1 %v3398_v58 }
 0x4c5   :  { %2648 = vmatprep.subr.bf16.mxu0 %v3241_v9  ;;  %2680 = vmatprep.subr.bf16.mxu1 %v3334_v54 }
 0x57a   :  { %v1280_v59 = vpop.f32.mrb[8].mxu0  ;;  %v1351_v63 = vpop.f32.mrb[24].mxu1 }
 0x57b   :  { %v1356_v32 = vadd.f32 %v1280_v59, %v3438_v49  ;;  %v1282_v27 = vpop.f32.mrb[9].mxu0  ;;  %v1353_v37 = vpop.f32.mrb[25].mxu1  ;;  %v2847_v47 = vadd.f32 %v1351_v63, %v3454_v5 }
 0x57c   :  { %v1357_v30 = vadd.f32 %v1282_v27, %v3440_v55  ;;  %v2848_v14 = vadd.f32 %v1353_v37, %v3456_v12 }
 0x57d   :  { %v2118_v38 = vmul.f32 -1.442695, %v1356_v32 }
 0x57e   :  { %v2119_v45 = vmul.f32 -1.442695, %v1357_v30  ;;  %v2120_v40 = vmul.f32 -1.442695, %v2848_v14 }
 0x57f   :  { %2945 = vpow2.f32 %v2118_v38 }
 0x580   :  { %2947 = vpow2.f32 %v2119_v45 }
 0x581   :  { %2949 = vpow2.f32 %v2120_v40 }
 0x582   :  { %2951 = vtanh.f32 %v2847_v47 }
 0x589   :  { %v2946_v46 = vpop.eup %2945 }
 0x58a   :  { %v2948_v53 = vpop.eup %2947  ;;  %v1363_v19 = vadd.f32 1.0, %v2946_v46 }
 0x58b   :  { %v1369_v28 = vadd.f32 1.0, %v2948_v53  ;;  %v2950_v49 = vpop.eup %2949 }
 0x58c   :  { %2953 = vrcp.f32 %v1363_v19  ;;  %v2952_v3 = vpop.eup %2951  ;;  %v1376_v59 = vadd.f32 1.0, %v2950_v49 }
 0x58d   :  { %2955 = vrcp.f32 %v1369_v28 }
 0x58e   :  { %2957 = vrcp.f32 %v1376_v59 }
 0x596   :  { %v2954_v55 = vpop.eup %2953 }
 0x597   :  { %v2956_v60 = vpop.eup %2955  ;;  %v1380_v16 = vmul.f32 %v2954_v55, %v2952_v3 }
 0x598   :  { %v1379_v32 = vmul.f32 %v2956_v60, %v3598_v18  ;;  %v2958_v63 = vpop.eup %2957 }
 0x59a   :  { %v3644_v27 = vadd.f32 %v1380_v16, %v1379_v32 }
 0x59c   :  { %2959 = vtanh.f32 %v3644_v27 }
 0x5a6   :  { %v2960_v37 = vpop.eup %2959 }
 0x5a7   :  { %v3647_v30 = vmul.f32 %v2960_v37, %v2958_v63 }
 0x5a9   :  { %1456 = vmatmul.mubr.f32.vlgmr.msra.gmra.mrb[10].mxu0 %v3647_v30  ;;  %1527 = vmatmul.mubr.f32.vlgmr.msra.gmra.mrb[26].mxu1 %v3647_v30 }
 0x5aa   :  { %2650 = vmatpush1.bf16.msra.mxu0 %v3243_v13  ;;  %2682 = vmatpush1.bf16.msra.mxu1 %v3340_v61 }
 0x5ab   :  { %2652 = vmatprep.subr.bf16.mxu0 %v3247_v22  ;;  %2684 = vmatprep.subr.bf16.mxu1 %v3343_v62 }
 0x5ac   :  { %1632 = vmatprep.mubr.f32.mxu0 %v3777_v31  ;;  %1703 = vmatprep.mubr.f32.mxu1 %v3777_v31 }
 0x5ae   :  { %2654 = vmatpush1.bf16.msra.mxu0 %v3249_v26  ;;  %2686 = vmatpush1.bf16.msra.mxu1 %v3350_v7 }
 0x5af   :  { %2656 = vmatprep.subr.bf16.mxu0 %v3252_v35  ;;  %2688 = vmatprep.subr.bf16.mxu1 %v3353_v8 }
 0x5b2   :  { %2658 = vmatpush1.bf16.msra.mxu0 %v3255_v39  ;;  %2690 = vmatpush1.bf16.msra.mxu1 %v3358_v48 }
 0x5b3   :  { %2660 = vmatprep.subr.bf16.mxu0 %v3258_v44  ;;  %2692 = vmatprep.subr.bf16.mxu1 %v3361_v17 }
 0x5b6   :  { %2662 = vmatpush1.bf16.msra.mxu0 %v3261_v52  ;;  %2694 = vmatpush1.bf16.msra.mxu1 %v3366_v56 }
 0x5b7   :  { %2664 = vmatprep.subr.bf16.mxu0 %v3264_v57  ;;  %2696 = vmatprep.subr.bf16.mxu1 %v3369_v25 }
 0x5ba   :  { %2666 = vmatpush1.bf16.msra.mxu0 %v3267_v1  ;;  %2698 = vmatpush1.bf16.msra.mxu1 %v3374_v2 }
 0x5bb   :  { %2668 = vmatprep.subr.bf16.mxu0 %v3270_v6  ;;  %2700 = vmatprep.subr.bf16.mxu1 %v3377_v33 }
 0x5be   :  { %2670 = vmatpush1.bf16.msra.mxu0 %v3273_v15  ;;  %2702 = vmatpush1.bf16.msra.mxu1 %v3382_v11 }
 0x5bf   :  { %2672 = vmatprep.subr.bf16.mxu0 %v3276_v20  ;;  %2704 = vmatprep.subr.bf16.mxu1 %v3385_v43 }
 0x5c2   :  { %2674 = vmatpush1.bf16.msra.mxu0 %v3279_v29  ;;  %2706 = vmatpush1.bf16.msra.mxu1 %v3390_v21 }
 0x5c3   :  { %2676 = vmatprep.subr.bf16.mxu0 %v3282_v34  ;;  %2708 = vmatprep.subr.bf16.mxu1 %v3393_v50 }
 0x5c6   :  { %2678 = vmatpush1.bf16.msra.mxu0 %v3285_v41  ;;  %2710 = vmatpush1.bf16.msra.mxu1 %v3398_v58 }
 0x5c7   :  { %2712 = vmatprep.subr.bf16.mxu0 %v3241_v9  ;;  %2744 = vmatprep.subr.bf16.mxu1 %v3334_v54 }
 0x67c   :  { %v1457_v18 = vpop.f32.mrb[10].mxu0  ;;  %v1528_v38 = vpop.f32.mrb[26].mxu1 }
 0x67d   :  { %v1533_v45 = vadd.f32 %v1457_v18, %v3442_v51  ;;  %v1459_v14 = vpop.f32.mrb[11].mxu0  ;;  %v1530_v40 = vpop.f32.mrb[27].mxu1  ;;  %v2849_v49 = vadd.f32 %v1528_v38, %v3454_v5 }
 0x67e   :  { %v1534_v47 = vadd.f32 %v1459_v14, %v3444_v4  ;;  %v2850_v19 = vadd.f32 %v1530_v40, %v3456_v12  ;;  %v1931_v14 = vld [vmem:[#allocation12 + $0x20] sm:$0xff]  ;;  %v1932_v40 = vld [vmem:[#allocation12 + $0x28] sm:$0xff] }
 0x67f   :  { %v2121_v46 = vmul.f32 -1.442695, %v1533_v45 }
 0x680   :  { %v2122_v53 = vmul.f32 -1.442695, %v1534_v47  ;;  %v2123_v28 = vmul.f32 -1.442695, %v2850_v19  ;;  %v2783_v47 = vpack.c.bf16 %v1932_v40, %v1931_v14 }
 0x681   :  { %2961 = vpow2.f32 %v2121_v46  ;;  %v1933_v46 = vld [vmem:[#allocation12 + $0x30] sm:$0xff] }
 0x682   :  { %2963 = vpow2.f32 %v2122_v53  ;;  %v1934_v53 = vld [vmem:[#allocation12 + $0x38] sm:$0xff] }
 0x683   :  { %2965 = vpow2.f32 %v2123_v28  ;;  %v2787_v19 = vpack.c.bf16 %v1934_v53, %v1933_v46  ;;  %v1935_v28 = vld [vmem:[#allocation12 + $0x40] sm:$0xff] }
 0x684   :  { %2967 = vtanh.f32 %v2849_v49  ;;  %v1936_v49 = vld [vmem:[#allocation12 + $0x48] sm:$0xff] }
 0x68b   :  { %v2962_v9 = vpop.eup %2961 }
 0x68c   :  { %v2964_v3 = vpop.eup %2963  ;;  %v1540_v54 = vadd.f32 1.0, %v2962_v9  ;;  %v2791_v9 = vpack.c.bf16 %v1936_v49, %v1935_v28 }
 0x68d   :  { %v1546_v55 = vadd.f32 1.0, %v2964_v3  ;;  %v2966_v51 = vpop.eup %2965  ;;  %v1937_v3 = vld [vmem:[#allocation12 + $0x50] sm:$0xff] }
 0x68e   :  { %2969 = vrcp.f32 %v1540_v54  ;;  %v2968_v60 = vpop.eup %2967  ;;  %v1553_v32 = vadd.f32 1.0, %v2966_v51  ;;  %v1938_v54 = vld [vmem:[#allocation12 + $0x58] sm:$0xff]  ;;  %v1939_v51 = vld [vmem:[#allocation12 + $0x60] sm:$0xff] }
 0x68f   :  { %2971 = vrcp.f32 %v1546_v55  ;;  %v2795_v55 = vpack.c.bf16 %v1938_v54, %v1937_v3 }
 0x690   :  { %2973 = vrcp.f32 %v1553_v32 }
 0x698   :  { %v2970_v4 = vpop.eup %2969 }
 0x699   :  { %v2972_v16 = vpop.eup %2971  ;;  %v1557_v59 = vmul.f32 %v2970_v4, %v2968_v60  ;;  %v1940_v60 = vld [vmem:[#allocation12 + $0x68] sm:$0xff]  ;;  %v1941_v4 = vld [vmem:[#allocation12 + $0x70] sm:$0xff] }
 0x69a   :  { %v1556_v63 = vmul.f32 %v2972_v16, %v3644_v27  ;;  %v2974_v18 = vpop.eup %2973  ;;  %v1942_v16 = vld [vmem:[#allocation12 + $0x78] sm:$0xff] }
 0x69c   :  { %v3690_v37 = vadd.f32 %v1557_v59, %v1556_v63  ;;  %v2803_v59 = vpack.c.bf16 %v1942_v16, %v1941_v4  ;;  %v2061_v16 = vld [vmem:[#allocation6 + $0x30] sm:$0xff] }
 0x69e   :  { %2975 = vtanh.f32 %v3690_v37 }
 0x6a8   :  { %v2976_v38 = vpop.eup %2975 }
 0x6a9   :  { %v3693_v45 = vmul.f32 %v2976_v38, %v2974_v18 }
 0x6ab   :  { %1633 = vmatmul.mubr.f32.vlgmr.msra.gmra.mrb[12].mxu0 %v3693_v45  ;;  %1704 = vmatmul.mubr.f32.vlgmr.msra.gmra.mrb[28].mxu1 %v3693_v45 }
 0x6ac   :  { %2714 = vmatpush1.bf16.msra.mxu0 %v3243_v13  ;;  %2746 = vmatpush1.bf16.msra.mxu1 %v3340_v61  ;;  %v1927_v13 = vld [vmem:[#allocation12] sm:$0xff] }
 0x6ad   :  { %2716 = vmatprep.subr.bf16.mxu0 %v3247_v22  ;;  %2748 = vmatprep.subr.bf16.mxu1 %v3343_v62  ;;  %v1928_v22 = vld [vmem:[#allocation12 + $0x8] sm:$0xff] }
 0x6ae   :  { %1809 = vmatprep.mubr.f32.mxu0 %v3777_v31  ;;  %1880 = vmatprep.mubr.f32.mxu1 %v3777_v31 }
 0x6b0   :  { %2718 = vmatpush1.bf16.msra.mxu0 %v3249_v26  ;;  %2750 = vmatpush1.bf16.msra.mxu1 %v3350_v7  ;;  %v2775_v26 = vpack.c.bf16 %v1928_v22, %v1927_v13  ;;  %v3779_v13 = vld [vmem:[#allocation20_spill] sm:$0xff] }
 0x6b1   :  { %2720 = vmatprep.subr.bf16.mxu0 %v3252_v35  ;;  %2752 = vmatprep.subr.bf16.mxu1 %v3353_v8 }
 0x6b4   :  { %2722 = vmatpush1.bf16.msra.mxu0 %v3255_v39  ;;  %2754 = vmatpush1.bf16.msra.mxu1 %v3358_v48 }
 0x6b5   :  { %2724 = vmatprep.subr.bf16.mxu0 %v3258_v44  ;;  %2756 = vmatprep.subr.bf16.mxu1 %v3361_v17 }
 0x6b8   :  { %2726 = vmatpush1.bf16.msra.mxu0 %v3261_v52  ;;  %2758 = vmatpush1.bf16.msra.mxu1 %v3366_v56 }
 0x6b9   :  { %2728 = vmatprep.subr.bf16.mxu0 %v3264_v57  ;;  %2760 = vmatprep.subr.bf16.mxu1 %v3369_v25 }
 0x6bc   :  { %2730 = vmatpush1.bf16.msra.mxu0 %v3267_v1  ;;  %2762 = vmatpush1.bf16.msra.mxu1 %v3374_v2  ;;  %v3778_v1 = vld [vmem:[#allocation19_spill] sm:$0xff] }
 0x6bd   :  { %2732 = vmatprep.subr.bf16.mxu0 %v3270_v6  ;;  %2764 = vmatprep.subr.bf16.mxu1 %v3377_v33 }
 0x6c0   :  { %2734 = vmatpush1.bf16.msra.mxu0 %v3273_v15  ;;  %2766 = vmatpush1.bf16.msra.mxu1 %v3382_v11 }
 0x6c1   :  { %2736 = vmatprep.subr.bf16.mxu0 %v3276_v20  ;;  %2768 = vmatprep.subr.bf16.mxu1 %v3385_v43 }
 0x6c4   :  { %2738 = vmatpush1.bf16.msra.mxu0 %v3279_v29  ;;  %2770 = vmatpush1.bf16.msra.mxu1 %v3390_v21  ;;  %v1929_v21 = vld [vmem:[#allocation12 + $0x10] sm:$0xff] }
 0x6c5   :  { %2740 = vmatprep.subr.bf16.mxu0 %v3282_v34  ;;  %2772 = vmatprep.subr.bf16.mxu1 %v3393_v50  ;;  %v1930_v50 = vld [vmem:[#allocation12 + $0x18] sm:$0xff] }
 0x6c6   :  { %v2779_v27 = vpack.c.bf16 %v1930_v50, %v1929_v21 }
 0x6c8   :  { %2742 = vmatpush1.bf16.msra.mxu0 %v3285_v41  ;;  %2774 = vmatpush1.bf16.msra.mxu1 %v3398_v58 }
 0x6c9   :  { %2776 = vmatprep.subr.bf16.mxu0 %v2775_v26 }
 0x77e   :  { %v1634_v35 = vpop.f32.mrb[12].mxu0  ;;  %v1705_v39 = vpop.f32.mrb[28].mxu1 }
 0x77f   :  { %v1710_v44 = vadd.f32 %v1634_v35, %v3446_v10  ;;  %v1636_v52 = vpop.f32.mrb[13].mxu0  ;;  %v1707_v57 = vpop.f32.mrb[29].mxu1  ;;  %v2851_v41 = vadd.f32 %v1705_v39, %v3454_v5 }
 0x780   :  { %v1711_v6 = vadd.f32 %v1636_v52, %v3778_v1  ;;  %v2852_v29 = vadd.f32 %v1707_v57, %v3456_v12 }
 0x781   :  { %v2124_v15 = vmul.f32 -1.442695, %v1710_v44 }
 0x782   :  { %v2125_v20 = vmul.f32 -1.442695, %v1711_v6  ;;  %v2126_v34 = vmul.f32 -1.442695, %v2852_v29  ;;  %v2056_v29 = vld [vmem:[#allocation6 + $0x8] sm:$0xff] }
 0x783   :  { %2977 = vpow2.f32 %v2124_v15 }
 0x784   :  { %2979 = vpow2.f32 %v2125_v20 }
 0x785   :  { %2981 = vpow2.f32 %v2126_v34 }
 0x786   :  { %2983 = vtanh.f32 %v2851_v41 }
 0x78d   :  { %v2978_v61 = vpop.eup %2977 }
 0x78e   :  { %v2980_v62 = vpop.eup %2979  ;;  %v1717_v7 = vadd.f32 1.0, %v2978_v61 }
 0x78f   :  { %v1723_v8 = vadd.f32 1.0, %v2980_v62  ;;  %v2982_v48 = vpop.eup %2981  ;;  %v2055_v62 = vld [vmem:[#allocation6] sm:$0xff] }
 0x790   :  { %2985 = vrcp.f32 %v1717_v7  ;;  %v2984_v17 = vpop.eup %2983  ;;  %v1730_v33 = vadd.f32 1.0, %v2982_v48 }
 0x791   :  { %2987 = vrcp.f32 %v1723_v8 }
 0x792   :  { %2989 = vrcp.f32 %v1730_v33 }
 0x79a   :  { %v2986_v56 = vpop.eup %2985 }
 0x79b   :  { %v2988_v25 = vpop.eup %2987  ;;  %v1734_v2 = vmul.f32 %v2986_v56, %v2984_v17  ;;  %v2058_v56 = vld [vmem:[#allocation6 + $0x18] sm:$0xff] }
 0x79c   :  { %v1733_v11 = vmul.f32 %v2988_v25, %v3690_v37  ;;  %v2990_v58 = vpop.eup %2989 }
 0x79e   :  { %v3734_v43 = vadd.f32 %v1734_v2, %v1733_v11  ;;  %v2057_v11 = vld [vmem:[#allocation6 + $0x10] sm:$0xff] }
 0x7a0   :  { %2991 = vtanh.f32 %v3734_v43 }
 0x7aa   :  { %v2992_v10 = vpop.eup %2991 }
 0x7ab   :  { %v1737_v31 = vmul.f32 %v2992_v10, %v2990_v58 }
 0x7ad   :  { %1810 = vmatmul.mubr.f32.vlgmr.msra.gmra.mrb[14].mxu0 %v1737_v31  ;;  %1881 = vmatmul.mubr.f32.vlgmr.msra.gmra.mrb[30].mxu1 %v1737_v31 }
 0x7ae   :  { %2778 = vmatpush3.bf16.msra.mxu0 %v2775_v26  ;;  %2187 = vmatprep.mubr.f32.mxu0 %v3463_v0  ;;  %v2799_v0 = vpack.c.bf16 %v1940_v60, %v1939_v51  ;;  %v2062_v60 = vld [vmem:[#allocation6 + $0x38] sm:$0xff] }
 0x7af   :  { %2780 = vmatprep.subr.bf16.mxu0 %v2779_v27 }
 0x7b2   :  { %2782 = vmatpush3.bf16.msra.mxu0 %v2779_v27 }
 0x7b3   :  { %2784 = vmatprep.subr.bf16.mxu0 %v2783_v47 }
 0x7b6   :  { %2786 = vmatpush3.bf16.msra.mxu0 %v2783_v47  ;;  %v2059_v47 = vld [vmem:[#allocation6 + $0x20] sm:$0xff] }
 0x7b7   :  { %2788 = vmatprep.subr.bf16.mxu0 %v2787_v19 }
 0x7ba   :  { %2790 = vmatpush3.bf16.msra.mxu0 %v2787_v19 }
 0x7bb   :  { %2792 = vmatprep.subr.bf16.mxu0 %v2791_v9 }
 0x7be   :  { %2794 = vmatpush3.bf16.msra.mxu0 %v2791_v9 }
 0x7bf   :  { %2796 = vmatprep.subr.bf16.mxu0 %v2795_v55 }
 0x7c2   :  { %2798 = vmatpush3.bf16.msra.mxu0 %v2795_v55 }
 0x7c3   :  { %2800 = vmatprep.subr.bf16.mxu0 %v2799_v0 }
 0x7c6   :  { %2802 = vmatpush3.bf16.msra.mxu0 %v2799_v0 }
 0x7c7   :  { %2804 = vmatprep.subr.bf16.mxu0 %v2803_v59 }
 0x7ca   :  { %2806 = vmatpush3.bf16.msra.mxu0 %v2803_v59 }
 0x7cd   :  { %2188 = vmatmul.mubr.f32.vlgmr.msra.gmra.mrb[16].mxu0 %v3509_v36 }
 0x7ce   :  { %2190 = vmatprep.mubr.f32.mxu0 %v3555_v24 }
 0x7d1   :  { %2191 = vmatmul.mubr.f32.gmra.mrb[18].mxu0 %v3601_v42 }
 0x7d2   :  { %2193 = vmatprep.mubr.f32.mxu0 %v3647_v30 }
 0x7d5   :  { %2194 = vmatmul.mubr.f32.gmra.mrb[20].mxu0 %v3693_v45 }
 0x7d6   :  { %2196 = vmatprep.mubr.f32.mxu0 %v1737_v31  ;;  %v2060_v31 = vld [vmem:[#allocation6 + $0x28] sm:$0xff] }
 0x880   :  { %v1811_v32 = vpop.f32.mrb[14].mxu0  ;;  %v1882_v63 = vpop.f32.mrb[30].mxu1 }
 0x881   :  { %v1887_v37 = vadd.f32 %v1811_v32, %v3450_v23  ;;  %v1813_v18 = vpop.f32.mrb[15].mxu0  ;;  %v1884_v38 = vpop.f32.mrb[31].mxu1  ;;  %v2853_v42 = vadd.f32 %v1882_v63, %v3454_v5  ;;  %v2130_v5 = vld [vmem:[%s3771_s5] ss:$0 sm:$0xff]  ;;  %s3136_s5 = smov [#allocation14]  }
 0x882   :  { %v1888_v22 = vadd.f32 %v1813_v18, %v3779_v13  ;;  %v2854_v36 = vadd.f32 %v1884_v38, %v3456_v12  ;;  %s2092_s25 = sshll.u32 %s3136_s5, 4  ;;  %s2093_s25 = int_to_ptr.vmem [resolvable:$true] %s2092_s25 }
 0x883   :  { %v2127_v26 = vmul.f32 -1.442695, %v1887_v37  ;;  %s3097_s26 = scalar_lea.vmem %s2093_s25, 1024  ;;  %p3102_p5 = scmp.lt.s32.totalorder %s2093_s25, %s2093_s25 }
 0x884   :  { %v2128_v35 = vmul.f32 -1.442695, %v1888_v22  ;;  %v2129_v24 = vmul.f32 -1.442695, %v2854_v36  ;;  %p3098_p4 = scmp.ne.s32.totalorder %s2093_s25, %s3097_s26  ;;  %p3103_p6 = scmp.lt.s32.totalorder %s3097_s26, %s3097_s26 }
 0x885   :  { %2993 = vpow2.f32 %v2127_v26 }
 0x886   :  { %2995 = vpow2.f32 %v2128_v35  ;;  %p3104_p7 = por %p3103_p6, %p3102_p5 }
 0x887   :  { %2997 = vpow2.f32 %v2129_v24 }
 0x888   :  { %2999 = vtanh.f32 %v2853_v42  ;;  %p3105_p8 = pnand %p3104_p7, %p3098_p4 }
 0x88f   :  { %v2994_v30 = vpop.eup %2993 }
 0x890   :  { %v2996_v45 = vpop.eup %2995  ;;  %v1894_v39 = vadd.f32 1.0, %v2994_v30 }
 0x891   :  { %v1900_v44 = vadd.f32 1.0, %v2996_v45  ;;  %v2998_v23 = vpop.eup %2997 }
 0x892   :  { %3001 = vrcp.f32 %v1894_v39  ;;  %v3000_v52 = vpop.eup %2999  ;;  %v1907_v15 = vadd.f32 1.0, %v2998_v23 }
 0x893   :  { %3003 = vrcp.f32 %v1900_v44 }
 0x894   :  { %3005 = vrcp.f32 %v1907_v15 }
 0x89c   :  { %v3002_v57 = vpop.eup %3001 }
 0x89d   :  { %v3004_v1 = vpop.eup %3003  ;;  %v1911_v6 = vmul.f32 %v3002_v57, %v3000_v52 }
 0x89e   :  { %v1910_v20 = vmul.f32 %v3004_v1, %v3734_v43  ;;  %v3006_v19 = vpop.eup %3005 }
 0x8a0   :  { %v2189_v12 = vpop.f32.mrb[16].mxu0  ;;  %v1912_v34 = vadd.f32 %v1911_v6, %v1910_v20 }
 0x8a1   :  { %v2022_v41 = vadd.f32 %v2189_v12, %v2130_v5  ;;  %v2016_v61 = vpop.f32.mrb[17].mxu0 }
 0x8a2   :  { %v2017_v7 = vadd.f32 %v2130_v5, %v2016_v61  ;;  %3007 = vtanh.f32 %v1912_v34 }
 0x8a3   :  { %v2064_v8 = vadd.f32 %v2056_v29, %v2022_v41 }
 0x8a4   :  { %v2063_v48 = vadd.f32 %v2055_v62, %v2017_v7  ;;  %v2192_v17 = vpop.f32.mrb[18].mxu0 }
 0x8a5   :  { %v2072_v25 = vmax.f32 %v2064_v8, 0.0  ;;  %v2032_v2 = vadd.f32 %v2192_v17, %v2130_v5  ;;  %v2026_v33 = vpop.f32.mrb[19].mxu0 }
 0x8a6   :  { %v2071_v43 = vmax.f32 %v2063_v48, 0.0  ;;  %v2027_v21 = vadd.f32 %v2130_v5, %v2026_v33 }
 0x8a7   :  { %2080 = vst [vmem:[#allocation14 + $0x8] sm:$0xff] %v2072_v25  ;;  %v2066_v50 = vadd.f32 %v2058_v56, %v2032_v2 }
 0x8a8   :  { %2079 = vst [vmem:[#allocation14] sm:$0xff] %v2071_v43  ;;  %v2065_v58 = vadd.f32 %v2057_v11, %v2027_v21  ;;  %v2195_v10 = vpop.f32.mrb[20].mxu0 }
 0x8a9   :  { %v2074_v27 = vmax.f32 %v2066_v50, 0.0  ;;  %v2042_v14 = vadd.f32 %v2195_v10, %v2130_v5  ;;  %v2036_v40 = vpop.f32.mrb[21].mxu0 }
 0x8aa   :  { %v2073_v46 = vmax.f32 %v2065_v58, 0.0  ;;  %v2037_v53 = vadd.f32 %v2130_v5, %v2036_v40 }
 0x8ab   :  { %2082 = vst [vmem:[#allocation14 + $0x18] sm:$0xff] %v2074_v27  ;;  %v2068_v28 = vadd.f32 %v2060_v31, %v2042_v14 }
 0x8ac   :  { %v3008_v49 = vpop.eup %3007  ;;  %2081 = vst [vmem:[#allocation14 + $0x10] sm:$0xff] %v2073_v46  ;;  %v2067_v9 = vadd.f32 %v2059_v47, %v2037_v53 }
 0x8ad   :  { %v2076_v3 = vmax.f32 %v2068_v28, 0.0  ;;  %v1914_v54 = vmul.f32 %v3008_v49, %v3006_v19 }
 0x8ae   :  { %v2075_v55 = vmax.f32 %v2067_v9, 0.0 }
 0x8af   :  { %2084 = vst [vmem:[#allocation14 + $0x28] sm:$0xff] %v2076_v3  ;;  %2197 = vmatmul.mubr.f32.gmra.mrb[22].mxu0 %v1914_v54 }
 0x8b0   :  { %2083 = vst [vmem:[#allocation14 + $0x20] sm:$0xff] %v2075_v55 }
 0x982   :  { %v2198_v51 = vpop.f32.mrb[22].mxu0 }
 0x983   :  { %v2052_v0 = vadd.f32 %v2198_v51, %v2130_v5  ;;  %v2046_v4 = vpop.f32.mrb[23].mxu0 }
 0x984   :  { %v2047_v59 = vadd.f32 %v2130_v5, %v2046_v4 }
 0x985   :  { %v2070_v32 = vadd.f32 %v2062_v60, %v2052_v0 }
 0x986   :  { %v2069_v63 = vadd.f32 %v2061_v16, %v2047_v59 }
 0x987   :  { %v2078_v37 = vmax.f32 %v2070_v32, 0.0 }
 0x988   :  { %v2077_v18 = vmax.f32 %v2069_v63, 0.0 }
 0x989   :  { %2086 = vst [vmem:[#allocation14 + $0x38] sm:$0xff] %v2078_v37 }
 0x98a   :  { %2085 = vst [vmem:[#allocation14 + $0x30] sm:$0xff] %v2077_v18 }
 0x98b   :  { %3108 = shalt.err (!%p3105_p8)
}
 0x98c   :  { %s3109_s29 = scalar_lea.hbm %s3772_s6, 1024 }
 0x98d   :  { %p3110_p9 = scmp.ne.s32.totalorder %s3772_s6, %s3109_s29  ;;  %p3113_p10 = scmp.lt.u32.totalorder %s3109_s29, %s3772_s6 }
 0x98f   :  { %p3115_p11 = pnand %p3113_p10, %p3110_p9 }
 0x991   :  { %3118 = shalt.err (!%p3115_p11)
}
 0x992   :  { %2098 = dma.vmem_to_hbm [thread:$0]  %s2093_s25, 1024, %s3772_s6, [#allocation8], %s3131_s1, %s3131_s1, %s3132_s21  }
 0x993   :  { %3125 = dma.done.wait [#allocation8], 1024  }
 0x994   :  { %3126 = vsyncadd [#allocation8], 4294966272 }
 0x995   :  { %2102 = vsyncpa [#allocation7], 1 }
 0x996   :  { %2103 = vsyncpa [#allocation10], 1 }
 0x997   :  { %2104 = vsyncpa [#allocation13], 1 }
 0x998   :  { %2105 = vsyncpa [#allocation8], 1 }

</bundles_post_ra>
